<compile_context>
chip_gen: v7x
topology: tpu7x:2x2x1
jax: 0.10.0
libtpu: 0.0.40
codegen_flags: <defaults>
</compile_context>

<pallas_src>
import functools

import jax
import jax.numpy as jnp
from jax.experimental import pallas as pl
from jax.experimental.pallas import tpu as pltpu


def _self_attn_kernel(gamma_ref, xfull_ref, xq_ref, w_ref, b_ref, o_ref,
                      k_scr, vt_scr, *, cq_pad, hw, mx_dtype, approx_recip):
    # gamma_ref: (1,)              SMEM scalar
    # xfull_ref: (1, C, HWp)       full spatial extent (resident per batch)
    # xq_ref:    (1, C, Tq)        query tile of x (streamed)
    # w_ref:     (2*cq_pad+C, C)   fused [Wq_pad; Wk_pad; Wv] in x.dtype
    # b_ref:     (2*cq_pad+C, 1)   fused biases, f32
    # o_ref:     (1, C, Tq)
    # k_scr:     (cq_pad, HWp)     per-batch key projection cache (mx_dtype)
    # vt_scr:    (HWp, C)          per-batch value projection, pre-transposed
    qi = pl.program_id(1)
    w = w_ref[...]
    b = b_ref[...]

    # ---- once per batch element: project k and v over the full key axis ----
    @pl.when(qi == 0)
    def _():
        x_full = xfull_ref[0]                                        # (C, HWp)
        proj_kv = jnp.dot(w[cq_pad:], x_full,
                          preferred_element_type=jnp.float32) + b[cq_pad:]
        k_scr[...] = proj_kv[:cq_pad].astype(mx_dtype)               # (cq_pad, HWp)
        # Store v transposed so the PV matmul below is a canonical contraction
        # (avoids materializing att^T, which is HWp x HWp).
        vt_scr[...] = proj_kv[cq_pad:].T.astype(mx_dtype)            # (HWp, C)

    # ---- per query tile ----
    x_q = xq_ref[0]                                                  # (C, Tq) native
    q = jnp.dot(w[:cq_pad], x_q,
                preferred_element_type=jnp.float32) + b[:cq_pad]     # (cq_pad, Tq)

    # energy[i, j] = sum_c q[c, i] * k[c, j]   (zero-padded Wq/Wk rows add 0)
    energy = jax.lax.dot_general(
        q.astype(mx_dtype), k_scr[...], (((0,), (0,)), ((), ())),
        preferred_element_type=jnp.float32)                          # (Tq, HWp)

    hw_pad = energy.shape[-1]
    if hw_pad != hw:                                                 # compile-time
        col = jax.lax.broadcasted_iota(jnp.int32, (1, hw_pad), 1)
        energy = energy + jnp.where(col < hw, 0.0, -jnp.inf).astype(jnp.float32)

    # Numerically stable softmax with DEFERRED normalization: PV uses the
    # un-normalized exp matrix, the small (Tq, C) result is rescaled per row.
    m = jnp.max(energy, axis=-1, keepdims=True)                      # (Tq, 1)
    e = jnp.exp(energy - m)                                          # (Tq, HWp) f32
    rsum = jnp.sum(e, axis=-1, keepdims=True)                        # (Tq, 1)

    out_t = jnp.dot(e.astype(mx_dtype), vt_scr[...],
                    preferred_element_type=jnp.float32)              # (Tq, C)
    out_t = out_t * pl.reciprocal(rsum, approx=approx_recip)
    out = out_t.T                                                    # (C, Tq) small xpose

    gamma = gamma_ref[0]
    # Residual in the input dtype; padded spatial columns sliced off outside.
    o_ref[0] = (gamma * out).astype(o_ref.dtype) + x_q


def _pick_query_tile(hw_pad: int, max_tile: int) -> int:
    """Largest multiple of 128 that divides hw_pad and is <= max_tile."""
    best, t = 128, 128
    while t <= min(hw_pad, max_tile):
        if hw_pad % t == 0:
            best = t
        t += 128
    return best


def self_attention_block(x_nchw, wq, bq, wk, bk, wv, bv, gamma, *,
                         max_query_tile=512, matmul_dtype=jnp.bfloat16):
    """x_nchw: (B, C, H, W); wq/wk: (C//8, C); wv: (C, C); biases 1-D; gamma scalar."""
    B, C, H, W = x_nchw.shape
    HW = H * W
    Cq = wq.shape[0]
    HW_pad = ((HW + 127) // 128) * 128            # lane-dense spatial axis
    Cq_pad = ((Cq + 7) // 8) * 8                  # sublane-tile aligned q/k slices
    CA_pad = 2 * Cq_pad + C
    Tq = _pick_query_tile(HW_pad, max_query_tile)
    num_q = HW_pad // Tq

    mx_dtype = jnp.dtype(matmul_dtype)
    approx_recip = bool(mx_dtype != jnp.dtype(jnp.float32))
    f32 = jnp.float32

    x = x_nchw.reshape(B, C, HW)
    if HW_pad != HW:
        x = jnp.pad(x, ((0, 0), (0, 0), (0, HW_pad - HW)))

    def pad_rows(w, b, rows):
        w_p = jnp.zeros((rows, C), f32).at[: w.shape[0]].set(w.astype(f32))
        b_p = jnp.zeros((rows,), f32).at[: b.shape[0]].set(b.astype(f32))
        return w_p, b_p

    wq_p, bq_p = pad_rows(wq, bq, Cq_pad)
    wk_p, bk_p = pad_rows(wk, bk, Cq_pad)
    # Weights in the activation dtype (single-pass MXU when x is bf16); biases
    # stay f32 (added to the f32 accumulator).
    w_all = jnp.concatenate([wq_p, wk_p, wv.astype(f32)], axis=0).astype(x.dtype)
    b_all = jnp.concatenate([bq_p, bk_p, bv.astype(f32)], axis=0).reshape(CA_pad, 1)
    gamma_arr = jnp.asarray(gamma, f32).reshape(1)

    xb = x.dtype.itemsize
    mxb = mx_dtype.itemsize

    cost = pl.CostEstimate(
        flops=int(B * (2 * (Cq_pad + C) * C * HW_pad          # k/v projection
                       + num_q * 2 * Cq_pad * C * Tq          # q projection
                       + 2 * Cq_pad * HW_pad * HW_pad         # energy
                       + 2 * C * HW_pad * HW_pad)),           # PV
        transcendentals=int(B * HW_pad * HW_pad),              # exp in softmax
        bytes_accessed=int(3 * B * C * HW_pad * xb + CA_pad * (C * xb + 4)),
    )

    # Per-step VMEM working set (double-buffered blocks + scratch + big temps).
    est = (2 * C * HW_pad * xb                                 # resident x block
           + 4 * C * Tq * xb                                   # q-tile in + out tile
           + 2 * CA_pad * (C * xb + 4)                         # weights + biases
           + Cq_pad * HW_pad * mxb + HW_pad * C * mxb          # k / v^T scratch
           + (Cq_pad + C) * HW_pad * 4                         # proj_kv temp
           + 2 * Tq * HW_pad * 4 + Tq * HW_pad * mxb           # energy, e, e(mx)
           + 8 * Tq * C * 4)                                   # small temporaries
    vmem_limit = int(min(max(2 * est, 32 * 1024 * 1024), 48 * 1024 * 1024))

    kernel = functools.partial(_self_attn_kernel, cq_pad=Cq_pad, hw=HW,
                               mx_dtype=mx_dtype, approx_recip=approx_recip)

    out = pl.pallas_call(
        kernel,
        out_shape=jax.ShapeDtypeStruct((B, C, HW_pad), x.dtype),
        grid_spec=pltpu.PrefetchScalarGridSpec(
            num_scalar_prefetch=0,
            grid=(B, num_q),
            in_specs=[
                pl.BlockSpec(memory_space=pltpu.MemorySpace.SMEM),      # gamma (1,)
                pl.BlockSpec((1, C, HW_pad), lambda b, q: (b, 0, 0)),   # x full (k/v)
                pl.BlockSpec((1, C, Tq), lambda b, q: (b, 0, q)),       # x q-tile
                pl.BlockSpec((CA_pad, C), lambda b, q: (0, 0)),         # fused weights
                pl.BlockSpec((CA_pad, 1), lambda b, q: (0, 0)),         # fused biases
            ],
            out_specs=pl.BlockSpec((1, C, Tq), lambda b, q: (b, 0, q)),
            scratch_shapes=[
                pltpu.VMEM((Cq_pad, HW_pad), mx_dtype),                 # k cache
                pltpu.VMEM((HW_pad, C), mx_dtype),                      # v^T cache
            ],
        ),
        compiler_params=pltpu.CompilerParams(
            dimension_semantics=("parallel", "arbitrary"),
            vmem_limit_bytes=vmem_limit),
        cost_estimate=cost,
    )(gamma_arr, x, x, w_all, b_all)

    return out[:, :, :HW].reshape(B, C, H, W)


def self_attention_ref(x, wq, bq, wk, bk, wv, bv, gamma):
    """Pure-JAX reference mirroring the PyTorch forward."""
    B, C, H, W = x.shape
    HW = H * W
    xf = x.reshape(B, C, HW)
    hp = jax.lax.Precision.HIGHEST

    def conv1x1(w, b):
        return jnp.einsum("oc,bch->boh", w, xf, precision=hp) + b[None, :, None]

    q = conv1x1(wq, bq)                                       # (B, Cq, HW)
    k = conv1x1(wk, bk)                                       # (B, Cq, HW)
    v = conv1x1(wv, bv)                                       # (B, C, HW)
    energy = jnp.einsum("bci,bcj->bij", q, k, precision=hp)   # (B, HW, HW)
    att = jax.nn.softmax(energy, axis=-1)
    out = jnp.einsum("bcj,bij->bci", v, att, precision=hp)    # (B, C, HW)
    return gamma * out.reshape(B, C, H, W) + x


if __name__ == "__main__":
    key = jax.random.PRNGKey(0)

    def make_inputs(k, B, C, H, W):
        Cq = C // 8
        ks = jax.random.split(k, 7)
        x = jax.random.normal(ks[0], (B, C, H, W), dtype=jnp.float32)
        wq = jax.random.normal(ks[1], (Cq, C), dtype=jnp.float32) * 0.1
        wk = jax.random.normal(ks[2], (Cq, C), dtype=jnp.float32) * 0.1
        wv = jax.random.normal(ks[3], (C, C), dtype=jnp.float32) * 0.1
        bq = jax.random.normal(ks[4], (Cq,), dtype=jnp.float32) * 0.1
        bk = jax.random.normal(ks[5], (Cq,), dtype=jnp.float32) * 0.1
        bv = jax.random.normal(ks[6], (C,), dtype=jnp.float32) * 0.1
        return x, wq, bq, wk, bk, wv, bv

    # PyTorch initializes gamma to 0 (output == x); use a nonzero value so the
    # attention path is actually exercised by the checks.
    gamma = jnp.float32(0.5)
    k1, k2 = jax.random.split(key)

    # Case 1: 16x16 map (HW=256, no padding mask), two query tiles so the
    #         per-batch k/v scratch reuse is exercised; exact f32 MXU path.
    args1 = make_inputs(k1, 2, 32, 16, 16)
    out1 = jax.block_until_ready(
        self_attention_block(*args1, gamma, max_query_tile=128,
                             matmul_dtype=jnp.float32))
    ref1 = self_attention_ref(*args1, gamma)
    err1 = float(jnp.max(jnp.abs(out1 - ref1)))
    assert out1.shape == args1[0].shape
    assert jnp.allclose(out1, ref1, atol=2e-3, rtol=2e-3), f"f32 path mismatch: {err1}"

    # Case 2: 12x12 map (HW=144 -> padded to 256, exercises the key mask) with
    #         default bf16 MXU operands + approx reciprocal -> looser tolerance.
    args2 = make_inputs(k2, 2, 32, 12, 12)
    out2 = jax.block_until_ready(
        self_attention_block(*args2, gamma, max_query_tile=128))
    ref2 = self_attention_ref(*args2, gamma)
    err2 = float(jnp.max(jnp.abs(out2 - ref2)))
    assert out2.shape == args2[0].shape
    assert jnp.allclose(out2, ref2, atol=3e-2, rtol=3e-2), f"bf16 path mismatch: {err2}"

    print("KERNEL_OK")
</pallas_src>

<mosaic_0001>
module attributes {stable_mosaic.version = 11 : i64} {
  func.func @_self_attn_kernel(%arg0: i32, %arg1: i32, %arg2: memref<1xf32, #tpu.memory_space<smem>>, %arg3: memref<1x32x256xf32, #tpu.memory_space<vmem>>, %arg4: memref<1x32x128xf32, #tpu.memory_space<vmem>>, %arg5: memref<48x32xf32, #tpu.memory_space<vmem>>, %arg6: memref<48x1xf32, #tpu.memory_space<vmem>>, %arg7: memref<1x32x128xf32, #tpu.memory_space<vmem>>, %arg8: memref<8x256xf32, #tpu.memory_space<vmem>>, %arg9: memref<256x32xf32, #tpu.memory_space<vmem>>) attributes {dimension_semantics = [#tpu.dimension_semantics<parallel>, #tpu.dimension_semantics<arbitrary>], iteration_bounds = array<i64: 2, 2>, scalar_prefetch = 0 : i64, scratch_operands = 2 : i64, tpu.core_type = #tpu.core_type<tc>, window_params = [{transform_indices = @transform_0, window_bounds = array<i64: 1>}, {transform_indices = @transform_1, window_bounds = array<i64: 1, 32, 256>}, {transform_indices = @transform_2, window_bounds = array<i64: 1, 32, 128>}, {pipeline_mode = #tpu.pipeline_mode<synchronous>, transform_indices = @transform_3, window_bounds = array<i64: 48, 32>}, {pipeline_mode = #tpu.pipeline_mode<synchronous>, transform_indices = @transform_4, window_bounds = array<i64: 48, 1>}, {transform_indices = @transform_5, window_bounds = array<i64: 1, 32, 128>}]} {
    %c0 = arith.constant 0 : index
    %c0_0 = arith.constant 0 : index
    %0 = vector.load %arg5[%c0, %c0_0] : memref<48x32xf32, #tpu.memory_space<vmem>>, vector<48x32xf32>
    %c0_1 = arith.constant 0 : index
    %c0_2 = arith.constant 0 : index
    %1 = vector.load %arg6[%c0_1, %c0_2] : memref<48x1xf32, #tpu.memory_space<vmem>>, vector<48x1xf32>
    %c0_i32 = arith.constant 0 : i32
    %2 = arith.cmpi eq, %arg1, %c0_i32 : i32
    %3 = arith.extui %2 : i1 to i32
    %c0_i32_3 = arith.constant 0 : i32
    %4 = arith.cmpi ne, %3, %c0_i32_3 : i32
    scf.if %4 {
      %c0_19 = arith.constant 0 : index
      %c0_20 = arith.constant 0 : index
      %c0_21 = arith.constant 0 : index
      %34 = vector.load %arg3[%c0_19, %c0_20, %c0_21] : memref<1x32x256xf32, #tpu.memory_space<vmem>>, vector<1x32x256xf32>
      %35 = vector.shape_cast %34 : vector<1x32x256xf32> to vector<32x256xf32>
      %36 = vector.extract_strided_slice %0 {offsets = [8, 0], sizes = [40, 32], strides = [1, 1]} : vector<48x32xf32> to vector<40x32xf32>
      %cst_22 = arith.constant dense<0.000000e+00> : vector<40x256xf32>
      %37 = tpu.matmul %36, %35, %cst_22 {dimension_numbers = #tpu.dot_dimension_numbers<[1], [0], [0], [1], [0, 0, 1, 1], [], []>} : vector<40x32xf32>, vector<32x256xf32>, vector<40x256xf32> -> vector<40x256xf32>
      %38 = vector.extract_strided_slice %1 {offsets = [8, 0], sizes = [40, 1], strides = [1, 1]} : vector<48x1xf32> to vector<40x1xf32>
      %39 = vector.broadcast %38 : vector<40x1xf32> to vector<40x256xf32>
      %40 = arith.addf %37, %39 : vector<40x256xf32>
      %41 = vector.extract_strided_slice %40 {offsets = [0, 0], sizes = [8, 256], strides = [1, 1]} : vector<40x256xf32> to vector<8x256xf32>
      %c0_23 = arith.constant 0 : index
      %c0_24 = arith.constant 0 : index
      %42 = vector.load %arg8[%c0_23, %c0_24] : memref<8x256xf32, #tpu.memory_space<vmem>>, vector<8x256xf32>
      tpu.vector_store %arg8[%c0_23, %c0_24], %41 {strides = array<i32>} : memref<8x256xf32, #tpu.memory_space<vmem>>, vector<8x256xf32>,
      %43 = vector.extract_strided_slice %40 {offsets = [8, 0], sizes = [32, 256], strides = [1, 1]} : vector<40x256xf32> to vector<32x256xf32>
      %44 = tpu.transpose %43, [1, 0] : vector<32x256xf32> -> vector<256x32xf32>
      %c0_25 = arith.constant 0 : index
      %c0_26 = arith.constant 0 : index
      %45 = vector.load %arg9[%c0_25, %c0_26] : memref<256x32xf32, #tpu.memory_space<vmem>>, vector<256x32xf32>
      tpu.vector_store %arg9[%c0_25, %c0_26], %44 {strides = array<i32>} : memref<256x32xf32, #tpu.memory_space<vmem>>, vector<256x32xf32>,
    } else {
    }
    %c0_4 = arith.constant 0 : index
    %c0_5 = arith.constant 0 : index
    %c0_6 = arith.constant 0 : index
    %5 = vector.load %arg4[%c0_4, %c0_5, %c0_6] : memref<1x32x128xf32, #tpu.memory_space<vmem>>, vector<1x32x128xf32>
    %6 = vector.shape_cast %5 : vector<1x32x128xf32> to vector<32x128xf32>
    %7 = vector.extract_strided_slice %0 {offsets = [0, 0], sizes = [8, 32], strides = [1, 1]} : vector<48x32xf32> to vector<8x32xf32>
    %cst = arith.constant dense<0.000000e+00> : vector<8x128xf32>
    %8 = tpu.matmul %7, %6, %cst {dimension_numbers = #tpu.dot_dimension_numbers<[1], [0], [0], [1], [0, 0, 1, 1], [], []>} : vector<8x32xf32>, vector<32x128xf32>, vector<8x128xf32> -> vector<8x128xf32>
    %9 = vector.extract_strided_slice %1 {offsets = [0, 0], sizes = [8, 1], strides = [1, 1]} : vector<48x1xf32> to vector<8x1xf32>
    %10 = vector.broadcast %9 : vector<8x1xf32> to vector<8x128xf32>
    %11 = arith.addf %8, %10 : vector<8x128xf32>
    %c0_7 = arith.constant 0 : index
    %c0_8 = arith.constant 0 : index
    %12 = vector.load %arg8[%c0_7, %c0_8] : memref<8x256xf32, #tpu.memory_space<vmem>>, vector<8x256xf32>
    %cst_9 = arith.constant dense<0.000000e+00> : vector<128x256xf32>
    %13 = tpu.matmul %11, %12, %cst_9 {dimension_numbers = #tpu.dot_dimension_numbers<[0], [0], [1], [1], [0, 1, 1, 1], [], []>} : vector<8x128xf32>, vector<8x256xf32>, vector<128x256xf32> -> vector<128x256xf32>
    %cst_10 = arith.constant dense<0xFF800000> : vector<128xf32>
    %14 = vector.multi_reduction <maximumf>, %13, %cst_10 [1] : vector<128x256xf32> to vector<128xf32>
    %15 = vector.shape_cast %14 : vector<128xf32> to vector<128x1xf32>
    %16 = vector.broadcast %15 : vector<128x1xf32> to vector<128x256xf32>
    %17 = arith.subf %13, %16 : vector<128x256xf32>
    %18 = math.exp %17 : vector<128x256xf32>
    %cst_11 = arith.constant dense<0.000000e+00> : vector<128xf32>
    %19 = vector.multi_reduction <add>, %18, %cst_11 [1] : vector<128x256xf32> to vector<128xf32>
    %20 = vector.shape_cast %19 : vector<128xf32> to vector<128x1xf32>
    %c0_12 = arith.constant 0 : index
    %c0_13 = arith.constant 0 : index
    %21 = vector.load %arg9[%c0_12, %c0_13] : memref<256x32xf32, #tpu.memory_space<vmem>>, vector<256x32xf32>
    %cst_14 = arith.constant dense<0.000000e+00> : vector<128x32xf32>
    %22 = tpu.matmul %18, %21, %cst_14 {dimension_numbers = #tpu.dot_dimension_numbers<[1], [0], [0], [1], [0, 0, 1, 1], [], []>} : vector<128x256xf32>, vector<256x32xf32>, vector<128x32xf32> -> vector<128x32xf32>
    %23 = tpu.reciprocal %20 : vector<128x1xf32> -> vector<128x1xf32>
    %24 = vector.broadcast %23 : vector<128x1xf32> to vector<128x32xf32>
    %25 = arith.mulf %22, %24 : vector<128x32xf32>
    %26 = tpu.transpose %25, [1, 0] : vector<128x32xf32> -> vector<32x128xf32>
    %c0_15 = arith.constant 0 : index
    %27 = memref.load %arg2[%c0_15] : memref<1xf32, #tpu.memory_space<smem>>
    %28 = vector.broadcast %27 : f32 to vector<32x128xf32>
    %29 = arith.mulf %28, %26 : vector<32x128xf32>
    %30 = arith.addf %29, %6 : vector<32x128xf32>
    %c0_16 = arith.constant 0 : index
    %c0_17 = arith.constant 0 : index
    %c0_18 = arith.constant 0 : index
    %31 = vector.load %arg7[%c0_16, %c0_17, %c0_18] : memref<1x32x128xf32, #tpu.memory_space<vmem>>, vector<1x32x128xf32>
    %32 = vector.shape_cast %31 : vector<1x32x128xf32> to vector<32x128xf32>
    %33 = vector.shape_cast %30 : vector<32x128xf32> to vector<1x32x128xf32>
    tpu.vector_store %arg7[%c0_16, %c0_17, %c0_18], %33 {strides = array<i32>} : memref<1x32x128xf32, #tpu.memory_space<vmem>>, vector<1x32x128xf32>,
    return
  }
  func.func @transform_0(%arg0: i32, %arg1: i32) -> i32 {
    %c0_i32 = arith.constant 0 : i32
    %c0_i32_0 = arith.constant 0 : i32
    return %c0_i32 : i32
  }
  func.func @transform_1(%arg0: i32, %arg1: i32) -> (i32, i32, i32) {
    %c0_i32 = arith.constant 0 : i32
    %c0_i32_0 = arith.constant 0 : i32
    %c0_i32_1 = arith.constant 0 : i32
    return %arg0, %c0_i32, %c0_i32_0 : i32, i32, i32
  }
  func.func @transform_2(%arg0: i32, %arg1: i32) -> (i32, i32, i32) {
    %c0_i32 = arith.constant 0 : i32
    %c0_i32_0 = arith.constant 0 : i32
    return %arg0, %c0_i32, %arg1 : i32, i32, i32
  }
  func.func @transform_3(%arg0: i32, %arg1: i32) -> (i32, i32) {
    %c0_i32 = arith.constant 0 : i32
    %c0_i32_0 = arith.constant 0 : i32
    %c0_i32_1 = arith.constant 0 : i32
    return %c0_i32, %c0_i32_0 : i32, i32
  }
  func.func @transform_4(%arg0: i32, %arg1: i32) -> (i32, i32) {
    %c0_i32 = arith.constant 0 : i32
    %c0_i32_0 = arith.constant 0 : i32
    %c0_i32_1 = arith.constant 0 : i32
    return %c0_i32, %c0_i32_0 : i32, i32
  }
  func.func @transform_5(%arg0: i32, %arg1: i32) -> (i32, i32, i32) {
    %c0_i32 = arith.constant 0 : i32
    %c0_i32_0 = arith.constant 0 : i32
    return %arg0, %c0_i32, %arg1 : i32, i32, i32
  }
}

</mosaic_0001>

<bundles_post_ra>
// kernel: tpu_custom_call.1
= control target key start
LH: loop header
LB: loop body
LE: loop exit
PB: predicated region body
PF: predicated region fallthrough
CT: control target
= control target key end

     0   :  { %s2459_s0 = inlined_call_operand.<no memory space> [shape: f32[1], index: 0, kind: input, shape index: {}]   ;;  %s2460_s1 = inlined_call_operand.vmem [shape: f32[2,32,256], index: 1, kind: input, shape index: {}]   ;;  %s2461_s2 = inlined_call_operand.hbm [shape: f32[2,32,256], index: 2, kind: input, shape index: {}]   ;;  %s2462_s3 = inlined_call_operand.vmem [shape: f32[48,32], index: 3, kind: input, shape index: {}]   ;;  %s2463_s4 = inlined_call_operand.vmem [shape: f32[48,1], index: 4, kind: input, shape index: {}]   ;;  %s2464_s5 = inlined_call_operand.hbm [shape: f32[2,32,256], index: 5, kind: output, shape index: {}]  }
   0x1   :  { %2468 = sst [smem:[#allocation13_spill]] %s2461_s2 }
   0x2   :  { %10 = sst [smem:[#allocation4]] %s2459_s0 }
   0x3   :  { %11 = vsyncpa [#allocation6], 0 }
   0x4   :  { %13 = vsyncpa [#allocation6 + $0x1], 0 }
   0x5   :  { %14 = vsyncpa [#allocation7], 0 }
   0x6   :  { %16 = vsyncpa [#allocation7 + $0x1], 0  ;;  %s2001_s20 = smov 0   ;;  %s2003_s21 = smov 0  }
   0x7   :  { %s2005_s22 = smov 0   ;;  %s2007_s23 = smov 0  }
   0x8   :  { %s2009_s24 = smov 0   ;;  %s2011_s25 = smov 0  }
   0x9   :  { %s2013_s26 = smov 0   ;;  %s2015_s27 = smov 0  }
   0xa LB: > { %s1428_s0 = sadd.s32 4294967295, %s1952_s27   ;;  %s1429_s28 = sadd.s32 4294967294, %s1952_s27   ;;  %s1952_s27 = sphi %s2015_s27, %s22_s27   ;;  %s1948_s26 = sphi %s2013_s26, %s2487_s26   ;;  %s1944_s25 = sphi %s2011_s25, %s2486_s25   ;;  %s1940_s24 = sphi %s2009_s24, %s2485_s24   ;;  %s1936_s23 = sphi %s2007_s23, %s2484_s23   ;;  %s1932_s22 = sphi %s2005_s22, %s2483_s22   ;;  %s1928_s21 = sphi %s2003_s21, %s2482_s21   ;;  %s1924_s20 = sphi %s2001_s20, %s2481_s20  }
   0xb   : > { %s31_s29 = sadd.s32 1, %s1944_s25  ;;  %s34_s30 = sadd.s32 1, %s1948_s26 }
   0xc   : > { %p32_p0 = scmp.ge.s32.totalorder %s31_s29, 2  ;;  %s90_s6 = sadd.s32 1, %s1932_s22 }
   0xd   : > { %p97_p1 = scmp.ne.s32.totalorder %s1932_s22, %s1928_s21  ;;  %p98_p2 = scmp.eq.s32.totalorder %s1952_s27, 0 }
   0xe   : > { %s2489_s29 = smov (%p32_p0, %s31_s29), 0  ;;  %s2491_s30 = smov (!%p32_p0, %s34_s30), %s1948_s26 }
   0xf   : > { %2469 = sst [smem:[#allocation11_spill]] %s2489_s29  ;;  %s86_s7 = ssub.s32 %s1944_s25, %s2489_s29 }
  0x10   : > { %p2054_p3 = por %p98_p2, %p97_p1  ;;  %p36_p4 = scmp.ge.s32.totalorder %s2491_s30, 2 }
  0x11   : > { %p103_p5 = scmp.ne.s32.totalorder %s1928_s21, %s1924_s20  ;;  %p104_p6 = scmp.eq.s32.totalorder %s1428_s0, 0 }
  0x12   : > { %p171_p7 = scmp.eq.s32.totalorder %s1428_s0, 3  ;;  %s2493_s30 = smov (%p36_p4, %s2491_s30), 0 }
  0x13   : > { %2471 = sst [smem:[#allocation12_spill]] %s2493_s30  ;;  %p2062_p8 = por %p104_p6, %p103_p5 }
  0x14   : > { %p2066_p9 = por %p171_p7, %p97_p1  ;;  %s85_s11 = ssub.s32 %s1948_s26, %s2493_s30 }
  0x15   : > { %p177_p10 = scmp.eq.s32.totalorder %s1429_s28, 3  ;;  %s87_s12 = sor.u32 %s86_s7, %s85_s11 }
  0x16   : > { %s2473_s10 = scalar_select %p2066_p9, 1, 0 }
  0x17   : > { %p88_p11 = scmp.eq.s32.totalorder %s87_s12, 0  ;;  %p2072_p12 = por %p177_p10, %p103_p5 }
  0x18   : > { %p1643_p13 = scmp.lt.s32.totalorder %s1952_s27, 4  ;;  %s214_s14 = sand.u32 1, %s1932_s22  }
  0x19   : > { %s2474_s13 = scalar_select %p2072_p12, 1, 0 }
  0x1a   : > { %s2079_s15 = scalar_select %p88_p11, %s1932_s22, %s90_s6  }
  0x1b   : > { %s1432_s16 = sshll.u32 %s214_s14, 5  ;;  %s1433_s17 = sshll.u32 %s1948_s26, 3 }
  0x1c   : > { %s223_s18 = sadd.s32 %s1944_s25, %s1433_s17  ;;  %s218_s19 = scalar_lea.vmem [#allocation5], %s1432_s16 }
  0x1d   : > { %s226_s0 = sshll.u32 %s218_s19, 4  ;;  %s1434_s29 = sshll.u32 %s223_s18, 7  ;;  %s2083_s0 = int_to_ptr.vmem [resolvable:$true] %s226_s0 }
  0x1e   : > { %s2475_s2 = sld [smem:[#allocation13_spill]]  ;;  %p2092_p0 = pnand %p1643_p13, %p2054_p3 }
  0x1f   : > { %s2096_s11 = scalar_lea.sflag [#allocation6], %s214_s14 }
  0x20   : > { %p1826_p2 = pneg %p2092_p0 }
  0x24   : > { %s2088_s7 = scalar_lea.hbm %s2475_s2, %s1434_s29  ;;  %s1829_s8 = scalar_lea.hbm %s2475_s2, 2048 }
  0x25   : > { %s1824_s12 = scalar_lea.hbm %s2088_s7, 512  ;;  %p1830_p3 = scmp.lt.u32.totalorder %s2088_s7, %s2475_s2 }
  0x26   : > { %p1825_p1 = scmp.ne.s32.totalorder %s2088_s7, %s1824_s12  ;;  %p1831_p6 = scmp.lt.u32.totalorder %s1829_s8, %s1824_s12 }
  0x27   : > { %p1833_p10 = scmp.lt.u32.totalorder %s1824_s12, %s2088_s7 }
  0x28   : > { %p1827_p4 = pnand %p1826_p2, %p1825_p1  ;;  %p1832_p7 = por %p1831_p6, %p1830_p3 }
  0x2a   : > { %p1828_p5 = pneg %p1827_p4  ;;  %p1834_p11 = por %p1833_p10, %p1832_p7 }
  0x2c   : > { %p1835_p13 = pnand %p1834_p11, %p1828_p5 }
  0x2e   : > { %1838 = shalt.err (!%p1835_p13)
}
  0x2f   : > { %s1839_s14 = scalar_lea.vmem %s2083_s0, 512  ;;  %s1954_s18 = smov [#allocation5]  }
  0x30   : > { %p1840_p1 = scmp.ne.s32.totalorder %s2083_s0, %s1839_s14  ;;  %s1844_s19 = sshll.u32 %s1954_s18, 4  ;;  %s1845_s19 = int_to_ptr.vmem [resolvable:$false] %s1844_s19 }
  0x31   : > { %s1846_s28 = scalar_lea.vmem %s1845_s19, 1024  ;;  %p1847_p9 = scmp.lt.s32.totalorder %s2083_s0, %s1845_s19 }
  0x32   : > { %p1842_p4 = pnand %p1840_p1, %p1826_p2  ;;  %p1848_p3 = scmp.lt.s32.totalorder %s1846_s28, %s1839_s14 }
  0x34   : > { %p1843_p12 = pneg %p1842_p4  ;;  %p1849_p6 = por %p1848_p3, %p1847_p9 }
  0x36   : > { %p1850_p7 = pnand %p1849_p6, %p1843_p12 }
  0x38   : > { %1853 = shalt.err (!%p1850_p7)
}
  0x39   : > { %s1955_s12 = smov 256   ;;  %s1956_s29 = smov 128  }
  0x3a   : > { %s1957_s30 = smov 8   ;;  %p1435_p2 = scmp.ge.s32.totalorder %s1952_s27, 1 }
  0x3b   : > { %1638 = dma.hbm_to_vmem [thread:$0]  (!%p2092_p0), %s2088_s7, 512, %s2083_s0, %s2096_s11, %s1955_s12, %s1956_s29, %s1957_s30  }
  0x3c   : > { %p234_p5 = scmp.lt.s32.totalorder %s1952_s27, 5 }
  0x3e   : > { %p235_p10 = pnand %p1435_p2, %p234_p5 }
  0x3f   : > { %s2127_s8 = sand.u32 (!%p235_p10), 1, %s1928_s21  }
  0x40   : > { %238 = sbr.rel (%p235_p10) target bundleno = 1603 (0x643), region = 40  ;;  %s1436_s16 = sshll.u32 (!%p235_p10), %s2127_s8, 5 }
  0x41   : > { %s241_s17 = scalar_lea.sflag (!%p235_p10), [#allocation6], %s2127_s8  ;;  %s2131_s14 = scalar_lea.vmem (!%p235_p10), [#allocation5], %s1436_s16 }
  0x47   : > { %1915 = dma.done.wait (%p2062_p8), %s241_s17, 512  }
  0x48   : > { %1917 = vsyncadd (%p2062_p8), %s241_s17, 4294966784  ;;  %p276_p9 = scmp.lt.s32.totalorder %s1940_s24, 1  ;;  %v2145_v0 = vld [vmem:[%s2462_s3] sm:$0xff]  ;;  %v282_v1 = vld [vmem:[%s2462_s3 + $0x8] sm:$0xff]  ;;  %s2182_s19 = scalar_lea.vmem [#allocation8], %s1436_s16 }
  0x49   : > { %v283_v2 = vld [vmem:[%s2462_s3 + $0x10] sm:$0xff]  ;;  %v284_v3 = vld [vmem:[%s2462_s3 + $0x18] sm:$0xff]  ;;  %v285_v4 = vld [vmem:[%s2462_s3 + $0x20] sm:$0xff]  ;;  %p1440_p8 = scmp.ne.s32.totalorder %s1936_s23, 0 }
  0x4a   : > { %s277_s0 = scalar_select %p276_p9, %s1940_s24, 1  ;;  %v286_v5 = vld [vmem:[%s2462_s3 + $0x28] sm:$0xff]  ;;  %v2165_v6 = vld [vmem:[%s2463_s4] sm:$0xff]  ;;  %v289_v8 = vld [vmem:[%s2463_s4 + $0x10] sm:$0xff] }
  0x4b   : > { %v288_v7 = vld [vmem:[%s2463_s4 + $0x8] sm:$0xff]  ;;  %v290_v9 = vld [vmem:[%s2463_s4 + $0x18] sm:$0xff]  ;;  %v291_v10 = vld [vmem:[%s2463_s4 + $0x20] sm:$0xff]  ;;  %296 = sbr.rel (%p1440_p8) target bundleno = 498 (0x1f2), region = 48  ;;  %v1958_v19 = vmov (!%p1440_p8), 0.0   ;;  %v1959_v24 = vmov (!%p1440_p8), 0  }
  0x4c   : > { %s1468_s7 = sshll.u32 %s277_s0, 6  ;;  %v292_v11 = vld [vmem:[%s2463_s4 + $0x28] sm:$0xff]  ;;  %410 = vmatprep.mubr.f32.mxu0 (!%p1440_p8), %v1958_v19  ;;  %428 = vmatprep.mubr.f32.mxu1 (!%p1440_p8), %v1958_v19  ;;  %vm330_vm0 = vcmask (!%p1440_p8), 261120  }
  0x4d   : > { %s280_s18 = scalar_lea.vmem %s2460_s1, %s1468_s7  ;;  %1721 = vset.pattern.permute.xlu0 (!%p1440_p8), %v1959_v24  ;;  %1722 = vset.pattern.permute.xlu1 (!%p1440_p8), %v1959_v24 }
  0x4e   : > { %v298_v12 = vld [vmem:[%s280_s18 + $0x8] sm:$0xff] (!%p1440_p8)  ;;  %v300_v13 = vld [vmem:[%s280_s18 + $0x18] sm:$0xff] (!%p1440_p8)  ;;  %v297_v14 = vld [vmem:[%s280_s18] sm:$0xff] (!%p1440_p8)  ;;  %312 = vperm.xlu0 (!%p1440_p8), %1721, %v289_v8   ;;  %322 = vperm.xlu1 (!%p1440_p8), %1722, %v291_v10  }
  0x4f   : > { %v1565_v15 = vpack.c.bf16 (!%p1440_p8), %v300_v13, %v298_v12  ;;  %v299_v16 = vld [vmem:[%s280_s18 + $0x10] sm:$0xff] (!%p1440_p8)  ;;  %v302_v17 = vld [vmem:[%s280_s18 + $0x28] sm:$0xff] (!%p1440_p8)  ;;  %v304_v18 = vld [vmem:[%s280_s18 + $0x38] sm:$0xff] (!%p1440_p8) }
  0x50   : > { %v1567_v20 = vpack.c.bf16 (!%p1440_p8), %v299_v16, %v297_v14  ;;  %v1569_v21 = vpack.c.bf16 (!%p1440_p8), %v304_v18, %v302_v17  ;;  %v301_v22 = vld [vmem:[%s280_s18 + $0x20] sm:$0xff] (!%p1440_p8)  ;;  %v303_v23 = vld [vmem:[%s280_s18 + $0x30] sm:$0xff] (!%p1440_p8) }
  0x51   : > { %1566 = vmatprep.subr.bf16.mxu0 (!%p1440_p8), %v1565_v15  ;;  %1611 = vmatprep.subr.bf16.mxu1 (!%p1440_p8), %v1565_v15  ;;  %v1571_v25 = vpack.c.bf16 (!%p1440_p8), %v303_v23, %v301_v22 }
  0x52   : > { %1568 = vmatpush1.bf16.msra.mxu0 %v1567_v20  ;;  %1613 = vmatpush1.bf16.msra.mxu1 %v1567_v20 }
  0x53   : > { %1570 = vmatprep.subr.bf16.mxu0 %v1569_v21  ;;  %1612 = vmatprep.subr.bf16.mxu1 %v1569_v21 }
  0x54   : > { %317 = vperm.xlu0 %1721, %v290_v9   ;;  %327 = vperm.xlu1 %1722, %v292_v11  }
  0x56   : > { %1572 = vmatpush1.bf16.msra.mxu0 %v1571_v25  ;;  %1614 = vmatpush1.bf16.msra.mxu1 %v1571_v25 }
  0x58   : > { %307 = vperm.xlu0 %1721, %v288_v7  }
  0x59   : > { %1441 = vmatmul.mubr.msk.f32.vlgmr.msra.gmra.mrb[0].mxu0 %vm330_vm0, %v282_v1  ;;  %1444 = vmatmul.mubr.msk.f32.vlgmr.msra.gmra.mrb[0].mxu1 %vm330_vm0, %v285_v4 }
  0x5a   : > { %416 = vmatprep.mubr.f32.mxu0 %v1958_v19  ;;  %434 = vmatprep.mubr.f32.mxu1 %v1958_v19 }
  0x5d   : > { %1442 = vmatmul.mubr.msk.f32.gmra.mrb[2].mxu0 %vm330_vm0, %v283_v2  ;;  %1445 = vmatmul.mubr.msk.f32.gmra.mrb[2].mxu1 %vm330_vm0, %v286_v5 }
  0x5e   : > { %422 = vmatprep.mubr.f32.mxu0 %v1958_v19 }
  0x61   : > { %1443 = vmatmul.mubr.msk.f32.gmra.mrb[4].mxu0 %vm330_vm0, %v284_v3 }
  0xcd   : > { %v313_v26 = vpop.permute.xlu0 %312  ;;  %v323_v42 = vpop.permute.xlu1 %322 }
  0xd3   : > { %v318_v27 = vpop.permute.xlu0 %317  ;;  %v328_v48 = vpop.permute.xlu1 %327 }
  0xd7   : > { %v308_v28 = vpop.permute.xlu0 %307 }
 0x12c   : > { %v412_v29 = vpop.f32.mrb[0].mxu0  ;;  %v430_v30 = vpop.f32.mrb[0].mxu1 }
 0x12d   : > { %v413_v31 = vadd.f32 %v412_v29, %v308_v28  ;;  %v414_v32 = vpop.f32.mrb[1].mxu0  ;;  %v432_v33 = vpop.f32.mrb[1].mxu1  ;;  %v431_v46 = vadd.f32 %v430_v30, %v323_v42 }
 0x12e   : > { %v415_v34 = vadd.f32 %v414_v32, %v308_v28  ;;  %v433_v47 = vadd.f32 %v432_v33, %v323_v42 }
 0x12f   : > { %441 = vst [vmem:[#allocation2] sm:$0xff] %v413_v31 }
 0x130   : > { %442 = vst [vmem:[#allocation2 + $0x8] sm:$0xff] %v415_v34  ;;  %v418_v35 = vpop.f32.mrb[2].mxu0  ;;  %v436_v36 = vpop.f32.mrb[2].mxu1 }
 0x131   : > { %v419_v37 = vadd.f32 %v418_v35, %v313_v26  ;;  %v420_v38 = vpop.f32.mrb[3].mxu0  ;;  %v438_v39 = vpop.f32.mrb[3].mxu1  ;;  %v437_v49 = vadd.f32 %v436_v36, %v328_v48 }
 0x132   : > { %v421_v40 = vadd.f32 %v420_v38, %v313_v26  ;;  %v439_v50 = vadd.f32 %v438_v39, %v328_v48 }
 0x133   : > { %443 = vxpose.xlu1.b32.start [1/4] (short) %v419_v37, 128 }
 0x134   : > { %v424_v41 = vpop.f32.mrb[4].mxu0  ;;  %475 = vxpose.xlu0.b32.start [1/4] (short) %v421_v40, 128 }
 0x135   : > { %v425_v43 = vadd.f32 %v424_v41, %v318_v27  ;;  %v426_v44 = vpop.f32.mrb[5].mxu0 }
 0x136   : > { %v427_v45 = vadd.f32 %v426_v44, %v318_v27 }
 0x137   : > { %444 = vxpose.xlu1.b32.cont [2/4] (short) %v425_v43, 128 }
 0x138   : > { %476 = vxpose.xlu0.b32.cont [2/4] (short) %v427_v45, 128 }
 0x13b   : > { %445 = vxpose.xlu1.b32.cont [3/4] (short) %v431_v46, 128 }
 0x13c   : > { %477 = vxpose.xlu0.b32.cont [3/4] (short) %v433_v47, 128 }
 0x13f   : > { %446 = vxpose.xlu1.b32.end [4/4] (short) %v437_v49, 128 }
 0x140   : > { %478 = vxpose.xlu0.b32.end [4/4] (short) %v439_v50, 128 }
 0x1b3   : > { %v459_v51 = vpop.trf.xlu1 }
 0x1b4   : > { %v491_v52 = vpop.trf.xlu0  ;;  %507 = vst.msk [vmem:[#allocation3] sm:$0xff] %vm330_vm0, %v459_v51 }
 0x1b5   : > { %523 = vst.msk [vmem:[#allocation3 + $0x80] sm:$0xff] %vm330_vm0, %v491_v52 }
 0x1b7   : > { %v460_v53 = vpop.trf.xlu1 }
 0x1b8   : > { %v492_v54 = vpop.trf.xlu0  ;;  %508 = vst.msk [vmem:[#allocation3 + $0x8] sm:$0xff] %vm330_vm0, %v460_v53 }
 0x1b9   : > { %524 = vst.msk [vmem:[#allocation3 + $0x88] sm:$0xff] %vm330_vm0, %v492_v54 }
 0x1bb   : > { %v461_v55 = vpop.trf.xlu1 }
 0x1bc   : > { %v493_v56 = vpop.trf.xlu0  ;;  %509 = vst.msk [vmem:[#allocation3 + $0x10] sm:$0xff] %vm330_vm0, %v461_v55 }
 0x1bd   : > { %525 = vst.msk [vmem:[#allocation3 + $0x90] sm:$0xff] %vm330_vm0, %v493_v56 }
 0x1bf   : > { %v462_v57 = vpop.trf.xlu1 }
 0x1c0   : > { %v494_v58 = vpop.trf.xlu0  ;;  %510 = vst.msk [vmem:[#allocation3 + $0x18] sm:$0xff] %vm330_vm0, %v462_v57 }
 0x1c1   : > { %526 = vst.msk [vmem:[#allocation3 + $0x98] sm:$0xff] %vm330_vm0, %v494_v58 }
 0x1c3   : > { %v463_v59 = vpop.trf.xlu1 }
 0x1c4   : > { %v495_v60 = vpop.trf.xlu0  ;;  %511 = vst.msk [vmem:[#allocation3 + $0x20] sm:$0xff] %vm330_vm0, %v463_v59 }
 0x1c5   : > { %527 = vst.msk [vmem:[#allocation3 + $0xa0] sm:$0xff] %vm330_vm0, %v495_v60 }
 0x1c7   : > { %v464_v61 = vpop.trf.xlu1 }
 0x1c8   : > { %v496_v62 = vpop.trf.xlu0  ;;  %512 = vst.msk [vmem:[#allocation3 + $0x28] sm:$0xff] %vm330_vm0, %v464_v61 }
 0x1c9   : > { %528 = vst.msk [vmem:[#allocation3 + $0xa8] sm:$0xff] %vm330_vm0, %v496_v62 }
 0x1cb   : > { %v465_v63 = vpop.trf.xlu1 }
 0x1cc   : > { %v497_v1 = vpop.trf.xlu0  ;;  %513 = vst.msk [vmem:[#allocation3 + $0x30] sm:$0xff] %vm330_vm0, %v465_v63 }
 0x1cd   : > { %529 = vst.msk [vmem:[#allocation3 + $0xb0] sm:$0xff] %vm330_vm0, %v497_v1 }
 0x1cf   : > { %v466_v2 = vpop.trf.xlu1 }
 0x1d0   : > { %v498_v3 = vpop.trf.xlu0  ;;  %514 = vst.msk [vmem:[#allocation3 + $0x38] sm:$0xff] %vm330_vm0, %v466_v2 }
 0x1d1   : > { %530 = vst.msk [vmem:[#allocation3 + $0xb8] sm:$0xff] %vm330_vm0, %v498_v3 }
 0x1d3   : > { %v467_v4 = vpop.trf.xlu1 }
 0x1d4   : > { %v499_v5 = vpop.trf.xlu0  ;;  %515 = vst.msk [vmem:[#allocation3 + $0x40] sm:$0xff] %vm330_vm0, %v467_v4 }
 0x1d5   : > { %531 = vst.msk [vmem:[#allocation3 + $0xc0] sm:$0xff] %vm330_vm0, %v499_v5 }
 0x1d7   : > { %v468_v7 = vpop.trf.xlu1 }
 0x1d8   : > { %v500_v8 = vpop.trf.xlu0  ;;  %516 = vst.msk [vmem:[#allocation3 + $0x48] sm:$0xff] %vm330_vm0, %v468_v7 }
 0x1d9   : > { %532 = vst.msk [vmem:[#allocation3 + $0xc8] sm:$0xff] %vm330_vm0, %v500_v8 }
 0x1db   : > { %v469_v9 = vpop.trf.xlu1 }
 0x1dc   : > { %v501_v10 = vpop.trf.xlu0  ;;  %517 = vst.msk [vmem:[#allocation3 + $0x50] sm:$0xff] %vm330_vm0, %v469_v9 }
 0x1dd   : > { %533 = vst.msk [vmem:[#allocation3 + $0xd0] sm:$0xff] %vm330_vm0, %v501_v10 }
 0x1df   : > { %v470_v11 = vpop.trf.xlu1 }
 0x1e0   : > { %v502_v12 = vpop.trf.xlu0  ;;  %518 = vst.msk [vmem:[#allocation3 + $0x58] sm:$0xff] %vm330_vm0, %v470_v11 }
 0x1e1   : > { %534 = vst.msk [vmem:[#allocation3 + $0xd8] sm:$0xff] %vm330_vm0, %v502_v12 }
 0x1e3   : > { %v471_v13 = vpop.trf.xlu1 }
 0x1e4   : > { %v503_v14 = vpop.trf.xlu0  ;;  %519 = vst.msk [vmem:[#allocation3 + $0x60] sm:$0xff] %vm330_vm0, %v471_v13 }
 0x1e5   : > { %535 = vst.msk [vmem:[#allocation3 + $0xe0] sm:$0xff] %vm330_vm0, %v503_v14 }
 0x1e7   : > { %v472_v15 = vpop.trf.xlu1 }
 0x1e8   : > { %v504_v16 = vpop.trf.xlu0  ;;  %520 = vst.msk [vmem:[#allocation3 + $0x68] sm:$0xff] %vm330_vm0, %v472_v15 }
 0x1e9   : > { %536 = vst.msk [vmem:[#allocation3 + $0xe8] sm:$0xff] %vm330_vm0, %v504_v16 }
 0x1eb   : > { %v473_v17 = vpop.trf.xlu1 }
 0x1ec   : > { %v505_v18 = vpop.trf.xlu0  ;;  %521 = vst.msk [vmem:[#allocation3 + $0x70] sm:$0xff] %vm330_vm0, %v473_v17 }
 0x1ed   : > { %537 = vst.msk [vmem:[#allocation3 + $0xf0] sm:$0xff] %vm330_vm0, %v505_v18 }
 0x1ef   : > { %v474_v19 = vpop.trf.xlu1 }
 0x1f0   : > { %v506_v20 = vpop.trf.xlu0  ;;  %522 = vst.msk [vmem:[#allocation3 + $0x78] sm:$0xff] %vm330_vm0, %v474_v19 }
 0x1f1   : > { %538 = vst.msk [vmem:[#allocation3 + $0xf8] sm:$0xff] %vm330_vm0, %v506_v20 }
 0x1f2 PF: > { %v539_v21 = vld [vmem:[%s2131_s14] sm:$0xff]  ;;  %v540_v22 = vld [vmem:[%s2131_s14 + $0x8] sm:$0xff]  ;;  %v541_v23 = vld [vmem:[%s2131_s14 + $0x10] sm:$0xff]  ;;  %v1960_v24 = vmov 0.0|0.0   ;;  %vm1961_vm1 = vmmov 0   ;;  %v1962_v27 = vmov 0.0  }
 0x1f3   : > { %1573 = vmatprep.subr.bf16.mxu0 %v1960_v24  ;;  %v1574_v25 = vpack.c.bf16 %v540_v22, %v539_v21  ;;  %v542_v26 = vld [vmem:[%s2131_s14 + $0x18] sm:$0xff]  ;;  %1562 = vmatprep.mubr.msk.f32.mxu0 %vm1961_vm1, %v1962_v27  ;;  %v1963_v28 = vmov 0   ;;  %vm548_vm2 = vcmask 261120   ;;  %v622_v31 = vld [vmem:[#allocation2] sm:$0xff]  ;;  %vm656_vm3 = vcmask 64512   ;;  %v1074_v50 = vld [vmem:[#allocation3 + $0x80] sm:$0xff] }
 0x1f4   : > { %1723 = vset.pattern.permute.xlu0 %v1963_v28  ;;  %769 = vmatprep.mubr.f32.mxu1 %v1962_v27  ;;  %v1577_v29 = vpack.c.bf16 %v542_v26, %v541_v23  ;;  %v623_v30 = vld [vmem:[#allocation2 + $0x8] sm:$0xff]  ;;  %v1075_v51 = vld [vmem:[#allocation3 + $0x88] sm:$0xff]  ;;  %v1058_v52 = vld [vmem:[#allocation3] sm:$0xff]  ;;  %s1299_s16 = sld [smem:[#allocation4]]  ;;  %s1464_s18 = sshll.u32 %s1940_s24, 3 }
 0x1f5   : > { %1575 = vmatpush3.bf16.msra.mxu0 %v1574_v25  ;;  %545 = vperm.xlu0 %1723, %v2165_v6   ;;  %v1579_v53 = vpack.c.bf16 %v1075_v51, %v1074_v50  ;;  %v1059_v54 = vld [vmem:[#allocation3 + $0x8] sm:$0xff]  ;;  %v1076_v55 = vld [vmem:[#allocation3 + $0x90] sm:$0xff]  ;;  %v1077_v56 = vld [vmem:[#allocation3 + $0x98] sm:$0xff]  ;;  %s1325_s28 = sadd.s32 %s1936_s23, %s1464_s18  ;;  %s1328_s29 = sshll.u32 %s2182_s19, 4  ;;  %s2403_s29 = int_to_ptr.vmem [resolvable:$true] %s1328_s29 }
 0x1f6   : > { %1576 = vmatprep.subr.bf16.mxu0 %v1960_v24  ;;  %705 = vmatprep.subr.mxu1 %v623_v30  ;;  %v1581_v57 = vpack.c.bf16 %v1059_v54, %v1058_v52  ;;  %v1583_v58 = vpack.c.bf16 %v1077_v56, %v1076_v55  ;;  %v1060_v59 = vld [vmem:[#allocation3 + $0x10] sm:$0xff]  ;;  %v1061_v60 = vld [vmem:[#allocation3 + $0x18] sm:$0xff]  ;;  %v1078_v61 = vld [vmem:[#allocation3 + $0xa0] sm:$0xff]  ;;  %s1465_s12 = sshll.u32 %s1325_s28, 7  ;;  %s1314_s23 = scalar_lea.sflag [#allocation7], %s2127_s8 }
 0x1f7   : > { %706 = vmatpush1.msra.mxu1 %v622_v31  ;;  %v1079_v62 = vld [vmem:[#allocation3 + $0xa8] sm:$0xff]  ;;  %v1585_v63 = vpack.c.bf16 %v1061_v60, %v1060_v59  ;;  %v1062_v2 = vld [vmem:[#allocation3 + $0x20] sm:$0xff]  ;;  %v1080_v4 = vld [vmem:[#allocation3 + $0xb0] sm:$0xff]  ;;  %s2401_s2 = scalar_lea.hbm %s2464_s5, %s1465_s12  ;;  %s1854_s30 = scalar_lea.vmem %s2403_s29, 512 }
 0x1f8   : > { %1615 = vmatprep.subr.bf16.mxu1 %v1579_v53  ;;  %v1587_v1 = vpack.c.bf16 %v1079_v62, %v1078_v61  ;;  %v1063_v3 = vld [vmem:[#allocation3 + $0x28] sm:$0xff]  ;;  %v1081_v5 = vld [vmem:[#allocation3 + $0xb8] sm:$0xff]  ;;  %v1064_v9 = vld [vmem:[#allocation3 + $0x30] sm:$0xff]  ;;  %p1855_p12 = scmp.ne.s32.totalorder %s2403_s29, %s1854_s30  ;;  %p2477_p0 = scmp.ne.s32.totalorder %s2473_s10, 0 }
 0x1f9   : > { %1578 = vmatpush3.bf16.msra.mxu0 %v1577_v29  ;;  %v1589_v7 = vpack.c.bf16 %v1063_v3, %v1062_v2  ;;  %v1591_v8 = vpack.c.bf16 %v1081_v5, %v1080_v4  ;;  %v1065_v10 = vld [vmem:[#allocation3 + $0x38] sm:$0xff]  ;;  %v1082_v25 = vld [vmem:[#allocation3 + $0xc0] sm:$0xff]  ;;  %v1083_v26 = vld [vmem:[#allocation3 + $0xc8] sm:$0xff]  ;;  %s1964_s17 = smov [#allocation8]  }
 0x1fa   : > { %1580 = vmatprep.subr.bf16.mxu0 %v1579_v53  ;;  %v1593_v11 = vpack.c.bf16 %v1065_v10, %v1064_v9  ;;  %v1595_v28 = vpack.c.bf16 %v1083_v26, %v1082_v25  ;;  %v1066_v29 = vld [vmem:[#allocation3 + $0x40] sm:$0xff]  ;;  %v1067_v30 = vld [vmem:[#allocation3 + $0x48] sm:$0xff]  ;;  %v1088_v50 = vld [vmem:[#allocation3 + $0xf0] sm:$0xff]  ;;  %p1856_p11 = pnand %p1855_p12, %p2477_p0  ;;  %s1858_s0 = sshll.u32 %s1964_s17, 4  ;;  %s1859_s0 = int_to_ptr.vmem [resolvable:$false] %s1858_s0 }
 0x1fb   : > { %v1089_v51 = vld [vmem:[#allocation3 + $0xf8] sm:$0xff]  ;;  %v1072_v54 = vld [vmem:[#allocation3 + $0x70] sm:$0xff]  ;;  %s1860_s6 = scalar_lea.vmem %s1859_s0, 1024  ;;  %p1861_p1 = scmp.lt.s32.totalorder %s2403_s29, %s1859_s0 }
 0x1fc   : > { %1563 = vmatmul.mubr.msk.f32.vlgmr.msra.gmra.mrb[0].mxu0 %vm548_vm2, %v2145_v0  ;;  %v1607_v53 = vpack.c.bf16 %v1089_v51, %v1088_v50  ;;  %v1073_v55 = vld [vmem:[#allocation3 + $0x78] sm:$0xff]  ;;  %p1857_p13 = pneg %p1856_p11  ;;  %p1862_p4 = scmp.lt.s32.totalorder %s1860_s6, %s1854_s30 }
 0x1fd   : > { %1582 = vmatpush3.bf16.msra.mxu0 %v1581_v57 }
 0x1fe   : > { %1584 = vmatprep.subr.bf16.mxu0 %v1583_v58  ;;  %p1863_p3 = por %p1862_p4, %p1861_p1 }
 0x200   : > { %p1864_p6 = pnand %p1863_p3, %p1857_p13 }
 0x201   : > { %1586 = vmatpush3.bf16.msra.mxu0 %v1585_v63 }
 0x202   : > { %1588 = vmatprep.subr.bf16.mxu0 %v1587_v1 }
 0x205   : > { %1590 = vmatpush3.bf16.msra.mxu0 %v1589_v7 }
 0x206   : > { %1592 = vmatprep.subr.bf16.mxu0 %v1591_v8 }
 0x209   : > { %1594 = vmatpush3.bf16.msra.mxu0 %v1593_v11 }
 0x20a   : > { %1596 = vmatprep.subr.bf16.mxu0 %v1595_v28 }
 0x274   : > { %v546_v32 = vpop.permute.xlu0 %545 }
 0x2cf   : > { %v618_v33 = vpop.f32.mrb[0].mxu0 }
 0x2d0   : > { %v619_v34 = vadd.f32 %v618_v33, %v546_v32  ;;  %v1564_v35 = vpop.f32.mrb[1].mxu0  ;;  %v1597_v32 = vpack.c.bf16 %v1067_v30, %v1066_v29 }
 0x2d1   : > { %v1085_v35 = vld [vmem:[#allocation3 + $0xd8] sm:$0xff] }
 0x2d2   : > { %624 = vxpose.xlu0.b32.start.end [1/1] (short) %v619_v34, 128  ;;  %1598 = vmatpush3.bf16.msra.mxu0 %v1597_v32  ;;  %v1084_v34 = vld [vmem:[#allocation3 + $0xd0] sm:$0xff] }
 0x352   : > { %v640_v36 = vpop.trf.xlu0 }
 0x353   : > { %1447 = vmatmul.mubr.msk.f32.vlgmr.msra.gmra.mrb[0].mxu1 %vm656_vm3, %v640_v36 }
 0x354   : > { %775 = vmatprep.mubr.f32.mxu1 %v1962_v27  ;;  %1623 = vmatpush3.bf16.msra.mxu1 %v1581_v57  ;;  %v1609_v57 = vpack.c.bf16 %v1073_v55, %v1072_v54 }
 0x355   : > { %1616 = vmatprep.subr.bf16.mxu1 %v1583_v58 }
 0x356   : > { %v641_v6 = vpop.trf.xlu0 }
 0x357   : > { %1448 = vmatmul.mubr.msk.f32.gmra.mrb[2].mxu1 %vm656_vm3, %v641_v6  ;;  %v1599_v6 = vpack.c.bf16 %v1085_v35, %v1084_v34 }
 0x358   : > { %781 = vmatprep.mubr.f32.mxu1 %v1962_v27  ;;  %1624 = vmatpush3.bf16.msra.mxu1 %v1585_v63 }
 0x359   : > { %1617 = vmatprep.subr.bf16.mxu1 %v1587_v1  ;;  %1600 = vmatprep.subr.bf16.mxu0 %v1599_v6 }
 0x35a   : > { %v642_v0 = vpop.trf.xlu0 }
 0x35b   : > { %1449 = vmatmul.mubr.msk.f32.gmra.mrb[4].mxu1 %vm656_vm3, %v642_v0  ;;  %v1068_v0 = vld [vmem:[#allocation3 + $0x50] sm:$0xff] }
 0x35c   : > { %787 = vmatprep.mubr.f32.mxu1 %v1962_v27  ;;  %1625 = vmatpush3.bf16.msra.mxu1 %v1589_v7 }
 0x35d   : > { %1618 = vmatprep.subr.bf16.mxu1 %v1591_v8 }
 0x35e   : > { %v643_v37 = vpop.trf.xlu0 }
 0x35f   : > { %1450 = vmatmul.mubr.msk.f32.gmra.mrb[6].mxu1 %vm656_vm3, %v643_v37  ;;  %v1069_v37 = vld [vmem:[#allocation3 + $0x58] sm:$0xff] }
 0x360   : > { %793 = vmatprep.mubr.f32.mxu1 %v1962_v27  ;;  %1626 = vmatpush3.bf16.msra.mxu1 %v1593_v11 }
 0x361   : > { %1619 = vmatprep.subr.bf16.mxu1 %v1595_v28 }
 0x362   : > { %v644_v38 = vpop.trf.xlu0 }
 0x363   : > { %1451 = vmatmul.mubr.msk.f32.gmra.mrb[8].mxu1 %vm656_vm3, %v644_v38 }
 0x364   : > { %799 = vmatprep.mubr.f32.mxu1 %v1962_v27  ;;  %1627 = vmatpush3.bf16.msra.mxu1 %v1597_v32 }
 0x365   : > { %1620 = vmatprep.subr.bf16.mxu1 %v1599_v6 }
 0x366   : > { %v645_v39 = vpop.trf.xlu0 }
 0x367   : > { %1452 = vmatmul.mubr.msk.f32.gmra.mrb[10].mxu1 %vm656_vm3, %v645_v39  ;;  %v1601_v39 = vpack.c.bf16 %v1069_v37, %v1068_v0 }
 0x368   : > { %805 = vmatprep.mubr.f32.mxu1 %v1962_v27 }
 0x369   : > { %1602 = vmatpush3.bf16.msra.mxu0 %v1601_v39  ;;  %1628 = vmatpush3.bf16.msra.mxu1 %v1601_v39 }
 0x36a   : > { %v646_v40 = vpop.trf.xlu0 }
 0x36b   : > { %1453 = vmatmul.mubr.msk.f32.gmra.mrb[12].mxu1 %vm656_vm3, %v646_v40 }
 0x36c   : > { %811 = vmatprep.mubr.f32.mxu1 %v1962_v27 }
 0x36e   : > { %v647_v41 = vpop.trf.xlu0 }
 0x36f   : > { %1454 = vmatmul.mubr.msk.f32.gmra.mrb[14].mxu1 %vm656_vm3, %v647_v41  ;;  %v1086_v41 = vld [vmem:[#allocation3 + $0xe0] sm:$0xff] }
 0x370   : > { %817 = vmatprep.mubr.f32.mxu1 %v1962_v27 }
 0x372   : > { %v648_v42 = vpop.trf.xlu0 }
 0x373   : > { %1455 = vmatmul.mubr.msk.f32.gmra.mrb[16].mxu1 %vm656_vm3, %v648_v42  ;;  %v1087_v42 = vld [vmem:[#allocation3 + $0xe8] sm:$0xff] }
 0x374   : > { %823 = vmatprep.mubr.f32.mxu1 %v1962_v27 }
 0x376   : > { %v649_v43 = vpop.trf.xlu0 }
 0x377   : > { %1456 = vmatmul.mubr.msk.f32.gmra.mrb[18].mxu1 %vm656_vm3, %v649_v43 }
 0x378   : > { %829 = vmatprep.mubr.f32.mxu1 %v1962_v27 }
 0x37a   : > { %v650_v44 = vpop.trf.xlu0 }
 0x37b   : > { %1457 = vmatmul.mubr.msk.f32.gmra.mrb[20].mxu1 %vm656_vm3, %v650_v44  ;;  %v1603_v44 = vpack.c.bf16 %v1087_v42, %v1086_v41 }
 0x37c   : > { %835 = vmatprep.mubr.f32.mxu1 %v1962_v27 }
 0x37d   : > { %1604 = vmatprep.subr.bf16.mxu0 %v1603_v44  ;;  %1621 = vmatprep.subr.bf16.mxu1 %v1603_v44 }
 0x37e   : > { %v651_v45 = vpop.trf.xlu0 }
 0x37f   : > { %1458 = vmatmul.mubr.msk.f32.gmra.mrb[22].mxu1 %vm656_vm3, %v651_v45  ;;  %v1070_v45 = vld [vmem:[#allocation3 + $0x60] sm:$0xff] }
 0x380   : > { %841 = vmatprep.mubr.f32.mxu1 %v1962_v27 }
 0x382   : > { %v652_v46 = vpop.trf.xlu0 }
 0x383   : > { %1459 = vmatmul.mubr.msk.f32.gmra.mrb[24].mxu1 %vm656_vm3, %v652_v46  ;;  %v1071_v46 = vld [vmem:[#allocation3 + $0x68] sm:$0xff] }
 0x384   : > { %847 = vmatprep.mubr.f32.mxu1 %v1962_v27 }
 0x386   : > { %v653_v47 = vpop.trf.xlu0 }
 0x387   : > { %1460 = vmatmul.mubr.msk.f32.gmra.mrb[26].mxu1 %vm656_vm3, %v653_v47 }
 0x388   : > { %853 = vmatprep.mubr.f32.mxu1 %v1962_v27 }
 0x38a   : > { %v654_v48 = vpop.trf.xlu0 }
 0x38b   : > { %1461 = vmatmul.mubr.msk.f32.gmra.mrb[28].mxu1 %vm656_vm3, %v654_v48  ;;  %v1605_v48 = vpack.c.bf16 %v1071_v46, %v1070_v45 }
 0x38c   : > { %859 = vmatprep.mubr.f32.mxu1 %v1962_v27 }
 0x38d   : > { %1606 = vmatpush3.bf16.msra.mxu0 %v1605_v48  ;;  %1629 = vmatpush3.bf16.msra.mxu1 %v1605_v48 }
 0x38e   : > { %v655_v49 = vpop.trf.xlu0  ;;  %1608 = vmatprep.subr.bf16.mxu0 %v1607_v53  ;;  %1622 = vmatprep.subr.bf16.mxu1 %v1607_v53 }
 0x38f   : > { %1462 = vmatmul.mubr.msk.f32.gmra.mrb[30].mxu1 %vm656_vm3, %v655_v49 }
 0x391   : > { %1610 = vmatpush3.bf16.msra.mxu0 %v1609_v57  ;;  %1630 = vmatpush3.bf16.msra.mxu1 %v1609_v57 }
 0x426   : > { %v2261_v12 = vpop.f32.mrb[0].mxu1 }
 0x427   : > { %v2263_v13 = vpop.f32.mrb[1].mxu1 }
 0x428   : > { %v866_v14 = vmax.f32 %v2261_v12, %v2263_v13 }
 0x42a   : > { %867 = vmax.xlane.f32.xlu1 %v866_v14  ;;  %v2267_v15 = vpop.f32.mrb[2].mxu1 }
 0x42b   : > { %v2269_v16 = vpop.f32.mrb[3].mxu1 }
 0x42c   : > { %v869_v17 = vmax.f32 %v2267_v15, %v2269_v16 }
 0x42e   : > { %870 = vmax.xlane.f32.xlu1 %v869_v17  ;;  %v2273_v18 = vpop.f32.mrb[4].mxu1 }
 0x42f   : > { %v2275_v19 = vpop.f32.mrb[5].mxu1 }
 0x430   : > { %v872_v20 = vmax.f32 %v2273_v18, %v2275_v19 }
 0x432   : > { %873 = vmax.xlane.f32.xlu1 %v872_v20  ;;  %v2279_v21 = vpop.f32.mrb[6].mxu1 }
 0x433   : > { %v2281_v22 = vpop.f32.mrb[7].mxu1 }
 0x434   : > { %v875_v23 = vmax.f32 %v2279_v21, %v2281_v22 }
 0x436   : > { %876 = vmax.xlane.f32.xlu1 %v875_v23  ;;  %v2285_v24 = vpop.f32.mrb[8].mxu1 }
 0x437   : > { %v2287_v27 = vpop.f32.mrb[9].mxu1 }
 0x438   : > { %v878_v31 = vmax.f32 %v2285_v24, %v2287_v27 }
 0x43a   : > { %879 = vmax.xlane.f32.xlu1 %v878_v31  ;;  %v2291_v33 = vpop.f32.mrb[10].mxu1 }
 0x43b   : > { %v2293_v36 = vpop.f32.mrb[11].mxu1 }
 0x43c   : > { %v881_v38 = vmax.f32 %v2291_v33, %v2293_v36 }
 0x43e   : > { %882 = vmax.xlane.f32.xlu1 %v881_v38  ;;  %v2297_v40 = vpop.f32.mrb[12].mxu1 }
 0x43f   : > { %v2299_v43 = vpop.f32.mrb[13].mxu1 }
 0x440   : > { %v884_v47 = vmax.f32 %v2297_v40, %v2299_v43 }
 0x442   : > { %885 = vmax.xlane.f32.xlu1 %v884_v47  ;;  %v2303_v49 = vpop.f32.mrb[14].mxu1 }
 0x443   : > { %v2305_v52 = vpop.f32.mrb[15].mxu1 }
 0x444   : > { %v887_v56 = vmax.f32 %v2303_v49, %v2305_v52 }
 0x446   : > { %888 = vmax.xlane.f32.xlu1 %v887_v56  ;;  %v2309_v58 = vpop.f32.mrb[16].mxu1 }
 0x447   : > { %v2311_v59 = vpop.f32.mrb[17].mxu1 }
 0x448   : > { %v890_v60 = vmax.f32 %v2309_v58, %v2311_v59 }
 0x44a   : > { %891 = vmax.xlane.f32.xlu1 %v890_v60  ;;  %v2315_v61 = vpop.f32.mrb[18].mxu1 }
 0x44b   : > { %v2317_v62 = vpop.f32.mrb[19].mxu1 }
 0x44c   : > { %v893_v63 = vmax.f32 %v2315_v61, %v2317_v62 }
 0x44e   : > { %894 = vmax.xlane.f32.xlu0 %v893_v63  ;;  %v2321_v1 = vpop.f32.mrb[20].mxu1 }
 0x44f   : > { %v2323_v2 = vpop.f32.mrb[21].mxu1 }
 0x450   : > { %v896_v3 = vmax.f32 %v2321_v1, %v2323_v2 }
 0x452   : > { %897 = vmax.xlane.f32.xlu1 %v896_v3  ;;  %v2327_v4 = vpop.f32.mrb[22].mxu1 }
 0x453   : > { %v2329_v5 = vpop.f32.mrb[23].mxu1 }
 0x454   : > { %v899_v7 = vmax.f32 %v2327_v4, %v2329_v5 }
 0x456   : > { %900 = vmax.xlane.f32.xlu1 %v899_v7  ;;  %v2333_v8 = vpop.f32.mrb[24].mxu1 }
 0x457   : > { %v2335_v9 = vpop.f32.mrb[25].mxu1 }
 0x458   : > { %v902_v10 = vmax.f32 %v2333_v8, %v2335_v9 }
 0x45a   : > { %903 = vmax.xlane.f32.xlu1 %v902_v10  ;;  %v2339_v11 = vpop.f32.mrb[26].mxu1 }
 0x45b   : > { %v2341_v14 = vpop.f32.mrb[27].mxu1 }
 0x45c   : > { %v905_v17 = vmax.f32 %v2339_v11, %v2341_v14 }
 0x45e   : > { %906 = vmax.xlane.f32.xlu1 %v905_v17  ;;  %v2345_v20 = vpop.f32.mrb[28].mxu1 }
 0x45f   : > { %v2347_v23 = vpop.f32.mrb[29].mxu1 }
 0x460   : > { %v908_v25 = vmax.f32 %v2345_v20, %v2347_v23 }
 0x462   : > { %909 = vmax.xlane.f32.xlu1 %v908_v25  ;;  %v2351_v26 = vpop.f32.mrb[30].mxu1 }
 0x463   : > { %v2353_v28 = vpop.f32.mrb[31].mxu1 }
 0x464   : > { %v911_v29 = vmax.f32 %v2351_v26, %v2353_v28 }
 0x466   : > { %912 = vmax.xlane.f32.xlu1 %v911_v29 }
 0x4b7   : > { %v868_v30 = vpop.xlane.xlu1 %867 }
 0x4b8   : > { %v914_v31 = vsub.f32 %v2261_v12, %v868_v30  ;;  %v915_v32 = vsub.f32 %v2263_v13, %v868_v30 }
 0x4ba   : > { %v946_v34 = vmul.f32 1.442695, %v914_v31  ;;  %v948_v35 = vmul.f32 1.442695, %v915_v32 }
 0x4bb   : > { %v871_v6 = vpop.xlane.xlu1 %870 }
 0x4bc   : > { %1724 = vpow2.f32 %v946_v34  ;;  %v916_v0 = vsub.f32 %v2267_v15, %v871_v6  ;;  %v917_v37 = vsub.f32 %v2269_v16, %v871_v6 }
 0x4bd   : > { %1726 = vpow2.f32 %v948_v35 }
 0x4be   : > { %v950_v38 = vmul.f32 1.442695, %v916_v0  ;;  %v952_v39 = vmul.f32 1.442695, %v917_v37 }
 0x4bf   : > { %v874_v41 = vpop.xlane.xlu1 %873 }
 0x4c0   : > { %1728 = vpow2.f32 %v950_v38  ;;  %v918_v42 = vsub.f32 %v2273_v18, %v874_v41  ;;  %v919_v44 = vsub.f32 %v2275_v19, %v874_v41 }
 0x4c1   : > { %1730 = vpow2.f32 %v952_v39 }
 0x4c2   : > { %v954_v12 = vmul.f32 1.442695, %v918_v42  ;;  %v956_v13 = vmul.f32 1.442695, %v919_v44 }
 0x4c3   : > { %v877_v45 = vpop.xlane.xlu1 %876 }
 0x4c4   : > { %1732 = vpow2.f32 %v954_v12  ;;  %v920_v46 = vsub.f32 %v2279_v21, %v877_v45  ;;  %v921_v15 = vsub.f32 %v2281_v22, %v877_v45 }
 0x4c5   : > { %1734 = vpow2.f32 %v956_v13 }
 0x4c6   : > { %v1725_v16 = vpop.eup %1724  ;;  %v958_v47 = vmul.f32 1.442695, %v920_v46  ;;  %v960_v48 = vmul.f32 1.442695, %v921_v15 }
 0x4c7   : > { %v1727_v50 = vpop.eup %1726  ;;  %v880_v51 = vpop.xlane.xlu1 %879 }
 0x4c8   : > { %1736 = vpow2.f32 %v958_v47  ;;  %1154 = vmatprep.mubr.f32.mxu0 %v1727_v50  ;;  %v922_v18 = vsub.f32 %v2285_v24, %v880_v51  ;;  %v923_v19 = vsub.f32 %v2287_v27, %v880_v51  ;;  %v1010_v53 = vadd.f32 %v1727_v50, %v1725_v16 }
 0x4c9   : > { %1738 = vpow2.f32 %v960_v48  ;;  %1155 = vmatmul.mubr.f32.vlgmr.msra.gmra.mrb[2].mxu0 %v1725_v16 }
 0x4ca   : > { %v1729_v54 = vpop.eup %1728  ;;  %v962_v55 = vmul.f32 1.442695, %v922_v18  ;;  %v964_v21 = vmul.f32 1.442695, %v923_v19  ;;  %1011 = vadd.xlane.f32.xlu1 %v1010_v53 }
 0x4cb   : > { %v1731_v22 = vpop.eup %1730  ;;  %v883_v56 = vpop.xlane.xlu1 %882 }
 0x4cc   : > { %1740 = vpow2.f32 %v962_v55  ;;  %1159 = vmatprep.mubr.f32.mxu0 %v1731_v22  ;;  %v924_v57 = vsub.f32 %v2291_v33, %v883_v56  ;;  %v925_v60 = vsub.f32 %v2293_v36, %v883_v56  ;;  %v1013_v63 = vadd.f32 %v1731_v22, %v1729_v54 }
 0x4cd   : > { %1742 = vpow2.f32 %v964_v21  ;;  %1160 = vmatmul.mubr.f32.gmra.mrb[4].mxu0 %v1729_v54 }
 0x4ce   : > { %v1733_v24 = vpop.eup %1732  ;;  %v966_v27 = vmul.f32 1.442695, %v924_v57  ;;  %v968_v3 = vmul.f32 1.442695, %v925_v60  ;;  %1014 = vadd.xlane.f32.xlu1 %v1013_v63 }
 0x4cf   : > { %v1735_v7 = vpop.eup %1734  ;;  %v886_v10 = vpop.xlane.xlu1 %885 }
 0x4d0   : > { %1744 = vpow2.f32 %v966_v27  ;;  %1164 = vmatprep.mubr.f32.mxu0 %v1735_v7  ;;  %v926_v17 = vsub.f32 %v2297_v40, %v886_v10  ;;  %v927_v25 = vsub.f32 %v2299_v43, %v886_v10  ;;  %v1016_v29 = vadd.f32 %v1735_v7, %v1733_v24 }
 0x4d1   : > { %1746 = vpow2.f32 %v968_v3  ;;  %1165 = vmatmul.mubr.f32.gmra.mrb[6].mxu0 %v1733_v24 }
 0x4d2   : > { %v1737_v33 = vpop.eup %1736  ;;  %v970_v36 = vmul.f32 1.442695, %v926_v17  ;;  %v972_v30 = vmul.f32 1.442695, %v927_v25  ;;  %1017 = vadd.xlane.f32.xlu1 %v1016_v29 }
 0x4d3   : > { %v1739_v31 = vpop.eup %1738  ;;  %v889_v32 = vpop.xlane.xlu1 %888 }
 0x4d4   : > { %1748 = vpow2.f32 %v970_v36  ;;  %1169 = vmatprep.mubr.f32.mxu0 %v1739_v31  ;;  %v928_v34 = vsub.f32 %v2303_v49, %v889_v32  ;;  %v929_v35 = vsub.f32 %v2305_v52, %v889_v32  ;;  %v1019_v6 = vadd.f32 %v1739_v31, %v1737_v33 }
 0x4d5   : > { %1750 = vpow2.f32 %v972_v30  ;;  %1170 = vmatmul.mubr.f32.gmra.mrb[8].mxu0 %v1737_v33 }
 0x4d6   : > { %v1741_v40 = vpop.eup %1740  ;;  %v974_v43 = vmul.f32 1.442695, %v928_v34  ;;  %v976_v0 = vmul.f32 1.442695, %v929_v35  ;;  %1020 = vadd.xlane.f32.xlu1 %v1019_v6 }
 0x4d7   : > { %v1743_v37 = vpop.eup %1742  ;;  %v892_v38 = vpop.xlane.xlu1 %891 }
 0x4d8   : > { %1752 = vpow2.f32 %v974_v43  ;;  %1174 = vmatprep.mubr.f32.mxu0 %v1743_v37  ;;  %v930_v39 = vsub.f32 %v2309_v58, %v892_v38  ;;  %v931_v41 = vsub.f32 %v2311_v59, %v892_v38  ;;  %v1022_v42 = vadd.f32 %v1743_v37, %v1741_v40 }
 0x4d9   : > { %1754 = vpow2.f32 %v976_v0  ;;  %1175 = vmatmul.mubr.f32.gmra.mrb[10].mxu0 %v1741_v40 }
 0x4da   : > { %v1745_v49 = vpop.eup %1744  ;;  %v978_v52 = vmul.f32 1.442695, %v930_v39  ;;  %v980_v44 = vmul.f32 1.442695, %v931_v41  ;;  %1023 = vadd.xlane.f32.xlu1 %v1022_v42 }
 0x4db   : > { %v1747_v12 = vpop.eup %1746  ;;  %v895_v13 = vpop.xlane.xlu0 %894 }
 0x4dc   : > { %1756 = vpow2.f32 %v978_v52  ;;  %1179 = vmatprep.mubr.f32.mxu0 %v1747_v12  ;;  %v932_v45 = vsub.f32 %v2315_v61, %v895_v13  ;;  %v933_v46 = vsub.f32 %v2317_v62, %v895_v13  ;;  %v1025_v15 = vadd.f32 %v1747_v12, %v1745_v49 }
 0x4dd   : > { %1758 = vpow2.f32 %v980_v44  ;;  %1180 = vmatmul.mubr.f32.gmra.mrb[12].mxu0 %v1745_v49 }
 0x4de   : > { %v1749_v58 = vpop.eup %1748  ;;  %v982_v59 = vmul.f32 1.442695, %v932_v45  ;;  %v984_v16 = vmul.f32 1.442695, %v933_v46  ;;  %1026 = vadd.xlane.f32.xlu1 %v1025_v15 }
 0x4df   : > { %v1751_v47 = vpop.eup %1750  ;;  %v898_v48 = vpop.xlane.xlu1 %897 }
 0x4e0   : > { %1760 = vpow2.f32 %v982_v59  ;;  %1184 = vmatprep.mubr.f32.mxu0 %v1751_v47  ;;  %v934_v50 = vsub.f32 %v2321_v1, %v898_v48  ;;  %v935_v51 = vsub.f32 %v2323_v2, %v898_v48  ;;  %v1028_v18 = vadd.f32 %v1751_v47, %v1749_v58 }
 0x4e1   : > { %1762 = vpow2.f32 %v984_v16  ;;  %1185 = vmatmul.mubr.f32.gmra.mrb[14].mxu0 %v1749_v58 }
 0x4e2   : > { %v1753_v61 = vpop.eup %1752  ;;  %v986_v62 = vmul.f32 1.442695, %v934_v50  ;;  %v988_v19 = vmul.f32 1.442695, %v935_v51  ;;  %1029 = vadd.xlane.f32.xlu1 %v1028_v18 }
 0x4e3   : > { %v1755_v53 = vpop.eup %1754  ;;  %v901_v54 = vpop.xlane.xlu1 %900 }
 0x4e4   : > { %1764 = vpow2.f32 %v986_v62  ;;  %1189 = vmatprep.mubr.f32.mxu0 %v1755_v53  ;;  %v936_v55 = vsub.f32 %v2327_v4, %v901_v54  ;;  %v937_v21 = vsub.f32 %v2329_v5, %v901_v54  ;;  %v1031_v22 = vadd.f32 %v1755_v53, %v1753_v61 }
 0x4e5   : > { %1766 = vpow2.f32 %v988_v19  ;;  %1190 = vmatmul.mubr.f32.gmra.mrb[16].mxu0 %v1753_v61 }
 0x4e6   : > { %v1757_v1 = vpop.eup %1756  ;;  %v990_v2 = vmul.f32 1.442695, %v936_v55  ;;  %v992_v56 = vmul.f32 1.442695, %v937_v21  ;;  %1032 = vadd.xlane.f32.xlu1 %v1031_v22 }
 0x4e7   : > { %v1759_v57 = vpop.eup %1758  ;;  %v904_v60 = vpop.xlane.xlu1 %903 }
 0x4e8   : > { %1768 = vpow2.f32 %v990_v2  ;;  %1194 = vmatprep.mubr.f32.mxu0 %v1759_v57  ;;  %v938_v63 = vsub.f32 %v2333_v8, %v904_v60  ;;  %v939_v24 = vsub.f32 %v2335_v9, %v904_v60  ;;  %v1034_v27 = vadd.f32 %v1759_v57, %v1757_v1 }
 0x4e9   : > { %1770 = vpow2.f32 %v992_v56  ;;  %1195 = vmatmul.mubr.f32.gmra.mrb[18].mxu0 %v1757_v1 }
 0x4ea   : > { %v1761_v4 = vpop.eup %1760  ;;  %v994_v5 = vmul.f32 1.442695, %v938_v63  ;;  %v996_v3 = vmul.f32 1.442695, %v939_v24  ;;  %1035 = vadd.xlane.f32.xlu1 %v1034_v27 }
 0x4eb   : > { %v1763_v7 = vpop.eup %1762  ;;  %v907_v10 = vpop.xlane.xlu1 %906 }
 0x4ec   : > { %1772 = vpow2.f32 %v994_v5  ;;  %v940_v17 = vsub.f32 %v2339_v11, %v907_v10  ;;  %v941_v25 = vsub.f32 %v2341_v14, %v907_v10  ;;  %1199 = vmatprep.mubr.f32.mxu0 %v1763_v7  ;;  %v1037_v29 = vadd.f32 %v1763_v7, %v1761_v4 }
 0x4ed   : > { %1774 = vpow2.f32 %v996_v3  ;;  %1200 = vmatmul.mubr.f32.gmra.mrb[20].mxu0 %v1761_v4 }
 0x4ee   : > { %v1765_v8 = vpop.eup %1764  ;;  %v998_v9 = vmul.f32 1.442695, %v940_v17  ;;  %v1000_v33 = vmul.f32 1.442695, %v941_v25  ;;  %1038 = vadd.xlane.f32.xlu1 %v1037_v29 }
 0x4ef   : > { %v1767_v36 = vpop.eup %1766  ;;  %v910_v30 = vpop.xlane.xlu1 %909 }
 0x4f0   : > { %1776 = vpow2.f32 %v998_v9  ;;  %v942_v31 = vsub.f32 %v2345_v20, %v910_v30  ;;  %v943_v32 = vsub.f32 %v2347_v23, %v910_v30  ;;  %1204 = vmatprep.mubr.f32.mxu0 %v1767_v36  ;;  %v1040_v34 = vadd.f32 %v1767_v36, %v1765_v8 }
 0x4f1   : > { %1778 = vpow2.f32 %v1000_v33  ;;  %1205 = vmatmul.mubr.f32.gmra.mrb[22].mxu0 %v1765_v8 }
 0x4f2   : > { %v1769_v11 = vpop.eup %1768  ;;  %v1002_v14 = vmul.f32 1.442695, %v942_v31  ;;  %v1004_v35 = vmul.f32 1.442695, %v943_v32  ;;  %1041 = vadd.xlane.f32.xlu1 %v1040_v34 }
 0x4f3   : > { %v1771_v6 = vpop.eup %1770  ;;  %v913_v40 = vpop.xlane.xlu1 %912 }
 0x4f4   : > { %1780 = vpow2.f32 %v1002_v14  ;;  %v944_v43 = vsub.f32 %v2351_v26, %v913_v40  ;;  %v945_v0 = vsub.f32 %v2353_v28, %v913_v40  ;;  %1209 = vmatprep.mubr.f32.mxu0 %v1771_v6  ;;  %v1043_v37 = vadd.f32 %v1771_v6, %v1769_v11 }
 0x4f5   : > { %1782 = vpow2.f32 %v1004_v35  ;;  %1210 = vmatmul.mubr.f32.gmra.mrb[24].mxu0 %v1769_v11 }
 0x4f6   : > { %v1773_v20 = vpop.eup %1772  ;;  %v1006_v23 = vmul.f32 1.442695, %v944_v43  ;;  %v1008_v38 = vmul.f32 1.442695, %v945_v0  ;;  %1044 = vadd.xlane.f32.xlu1 %v1043_v37 }
 0x4f7   : > { %v1775_v39 = vpop.eup %1774 }
 0x4f8   : > { %1784 = vpow2.f32 %v1006_v23  ;;  %1214 = vmatprep.mubr.f32.mxu1 %v1775_v39  ;;  %v1046_v41 = vadd.f32 %v1775_v39, %v1773_v20 }
 0x4f9   : > { %1786 = vpow2.f32 %v1008_v38  ;;  %1215 = vmatmul.mubr.f32.vlgmr.msra.gmra.mrb[32].mxu1 %v1773_v20 }
 0x4fa   : > { %v1777_v42 = vpop.eup %1776  ;;  %1047 = vadd.xlane.f32.xlu1 %v1046_v41 }
 0x4fb   : > { %v1779_v49 = vpop.eup %1778 }
 0x4fc   : > { %1219 = vmatprep.mubr.f32.mxu1 %v1779_v49  ;;  %v1049_v26 = vadd.f32 %v1779_v49, %v1777_v42 }
 0x4fd   : > { %1220 = vmatmul.mubr.f32.gmra.mrb[34].mxu1 %v1777_v42 }
 0x4fe   : > { %v1781_v28 = vpop.eup %1780  ;;  %1050 = vadd.xlane.f32.xlu1 %v1049_v26 }
 0x4ff   : > { %v1783_v52 = vpop.eup %1782 }
 0x500   : > { %1224 = vmatprep.mubr.f32.mxu1 %v1783_v52  ;;  %v1052_v44 = vadd.f32 %v1783_v52, %v1781_v28 }
 0x501   : > { %1225 = vmatmul.mubr.f32.gmra.mrb[36].mxu1 %v1781_v28 }
 0x502   : > { %v1785_v12 = vpop.eup %1784  ;;  %1053 = vadd.xlane.f32.xlu1 %v1052_v44 }
 0x503   : > { %v1787_v13 = vpop.eup %1786 }
 0x504   : > { %1229 = vmatprep.mubr.f32.mxu1 %v1787_v13  ;;  %v1055_v45 = vadd.f32 %v1787_v13, %v1785_v12 }
 0x505   : > { %1230 = vmatmul.mubr.f32.gmra.mrb[38].mxu1 %v1785_v12 }
 0x506   : > { %1056 = vadd.xlane.f32.xlu1 %v1055_v45 }
 0x557   : > { %v1012_v46 = vpop.xlane.xlu1 %1011 }
 0x558   : > { %1788 = vrcp.f32 %v1012_v46 }
 0x55b   : > { %v1015_v15 = vpop.xlane.xlu1 %1014 }
 0x55c   : > { %1790 = vrcp.f32 %v1015_v15 }
 0x55f   : > { %v1018_v58 = vpop.xlane.xlu1 %1017 }
 0x560   : > { %1792 = vrcp.f32 %v1018_v58 }
 0x562   : > { %v1789_v62 = vpop.eup %1788 }
 0x563   : > { %v1021_v59 = vpop.xlane.xlu1 %1020 }
 0x564   : > { %1794 = vrcp.f32 %v1021_v59 }
 0x566   : > { %v1791_v21 = vpop.eup %1790 }
 0x567   : > { %v1024_v16 = vpop.xlane.xlu1 %1023 }
 0x568   : > { %1796 = vrcp.f32 %v1024_v16 }
 0x56a   : > { %v1793_v60 = vpop.eup %1792 }
 0x56b   : > { %v1027_v47 = vpop.xlane.xlu1 %1026 }
 0x56c   : > { %1798 = vrcp.f32 %v1027_v47 }
 0x56e   : > { %v1795_v3 = vpop.eup %1794 }
 0x56f   : > { %v1030_v48 = vpop.xlane.xlu1 %1029 }
 0x570   : > { %1800 = vrcp.f32 %v1030_v48 }
 0x572   : > { %v1797_v29 = vpop.eup %1796 }
 0x573   : > { %v1033_v18 = vpop.xlane.xlu1 %1032 }
 0x574   : > { %1802 = vrcp.f32 %v1033_v18 }
 0x576   : > { %v1799_v31 = vpop.eup %1798 }
 0x577   : > { %v1036_v22 = vpop.xlane.xlu1 %1035 }
 0x578   : > { %1804 = vrcp.f32 %v1036_v22 }
 0x57a   : > { %v1801_v6 = vpop.eup %1800 }
 0x57b   : > { %v1039_v4 = vpop.xlane.xlu1 %1038 }
 0x57c   : > { %1806 = vrcp.f32 %v1039_v4 }
 0x57e   : > { %v1803_v20 = vpop.eup %1802 }
 0x57f   : > { %v1042_v8 = vpop.xlane.xlu1 %1041 }
 0x580   : > { %1808 = vrcp.f32 %v1042_v8 }
 0x582   : > { %v1805_v49 = vpop.eup %1804 }
 0x583   : > { %v1045_v14 = vpop.xlane.xlu1 %1044 }
 0x584   : > { %1810 = vrcp.f32 %v1045_v14  ;;  %v1822_v14 = vld [vmem:[%s2131_s14 + $0x10] sm:$0xff] }
 0x586   : > { %v1807_v13 = vpop.eup %1806 }
 0x587   : > { %v1048_v23 = vpop.xlane.xlu1 %1047 }
 0x588   : > { %1812 = vrcp.f32 %v1048_v23 }
 0x58a   : > { %v1809_v59 = vpop.eup %1808 }
 0x58b   : > { %v1051_v44 = vpop.xlane.xlu1 %1050 }
 0x58c   : > { %1814 = vrcp.f32 %v1051_v44 }
 0x58e   : > { %v1811_v18 = vpop.eup %1810 }
 0x58f   : > { %v1054_v16 = vpop.xlane.xlu1 %1053 }
 0x590   : > { %1816 = vrcp.f32 %v1054_v16 }
 0x59c   : > { %v1506_v50 = vpop.f32.mrb[2].mxu0 }
 0x59d   : > { %v1507_v51 = vpop.f32.mrb[3].mxu0 }
 0x59e   : > { %v1508_v61 = vadd.f32 %v1507_v51, %v1506_v50 }
 0x5a0   : > { %v1509_v19 = vpop.f32.mrb[4].mxu0  ;;  %v1251_v53 = vmul.f32 %v1789_v62, %v1508_v61 }
 0x5a1   : > { %v1510_v54 = vpop.f32.mrb[5].mxu0 }
 0x5a2   : > { %v1511_v55 = vadd.f32 %v1510_v54, %v1509_v19  ;;  %1267 = vxpose.xlu1.b32.start [1/16] (narrow) %v1251_v53, 32  ;;  %v1057_v53 = vpop.xlane.xlu1 %1056 }
 0x5a3   : > { %1818 = vrcp.f32 %v1057_v53 }
 0x5a4   : > { %v1252_v1 = vmul.f32 %v1791_v21, %v1511_v55  ;;  %v1512_v2 = vpop.f32.mrb[6].mxu0  ;;  %v1813_v55 = vpop.eup %1812 }
 0x5a5   : > { %v1513_v56 = vpop.f32.mrb[7].mxu0 }
 0x5a6   : > { %v1514_v57 = vadd.f32 %v1513_v56, %v1512_v2  ;;  %1268 = vxpose.xlu1.b32.cont [2/16] (narrow) %v1252_v1, 32  ;;  %v1815_v56 = vpop.eup %1814 }
 0x5a8   : > { %v1253_v63 = vmul.f32 %v1793_v60, %v1514_v57  ;;  %v1515_v24 = vpop.f32.mrb[8].mxu0 }
 0x5a9   : > { %v1516_v27 = vpop.f32.mrb[9].mxu0 }
 0x5aa   : > { %v1517_v5 = vadd.f32 %v1516_v27, %v1515_v24  ;;  %1269 = vxpose.xlu1.b32.cont [3/16] (narrow) %v1253_v63, 32  ;;  %v1817_v27 = vpop.eup %1816 }
 0x5ac   : > { %v1254_v7 = vmul.f32 %v1795_v3, %v1517_v5  ;;  %v1518_v10 = vpop.f32.mrb[10].mxu0 }
 0x5ad   : > { %v1519_v17 = vpop.f32.mrb[11].mxu0 }
 0x5ae   : > { %v1520_v25 = vadd.f32 %v1519_v17, %v1518_v10  ;;  %1270 = vxpose.xlu1.b32.cont [4/16] (narrow) %v1254_v7, 32  ;;  %v1819_v10 = vpop.eup %1818 }
 0x5b0   : > { %v1255_v9 = vmul.f32 %v1797_v29, %v1520_v25  ;;  %v1521_v33 = vpop.f32.mrb[12].mxu0  ;;  %v1300_v25 = vstv %s1299_s16 }
 0x5b1   : > { %v1522_v36 = vpop.f32.mrb[13].mxu0 }
 0x5b2   : > { %v1523_v30 = vadd.f32 %v1522_v36, %v1521_v33  ;;  %1271 = vxpose.xlu1.b32.cont [5/16] (narrow) %v1255_v9, 32  ;;  %v1820_v9 = vld [vmem:[%s2131_s14] sm:$0xff] }
 0x5b4   : > { %v1256_v32 = vmul.f32 %v1799_v31, %v1523_v30  ;;  %v1524_v34 = vpop.f32.mrb[14].mxu0  ;;  %v1821_v31 = vld [vmem:[%s2131_s14 + $0x8] sm:$0xff] }
 0x5b5   : > { %v1525_v11 = vpop.f32.mrb[15].mxu0 }
 0x5b6   : > { %v1526_v35 = vadd.f32 %v1525_v11, %v1524_v34  ;;  %1272 = vxpose.xlu1.b32.cont [6/16] (narrow) %v1256_v32, 32 }
 0x5b8   : > { %v1257_v40 = vmul.f32 %v1801_v6, %v1526_v35  ;;  %v1527_v43 = vpop.f32.mrb[16].mxu0 }
 0x5b9   : > { %v1528_v0 = vpop.f32.mrb[17].mxu0 }
 0x5ba   : > { %v1529_v37 = vadd.f32 %v1528_v0, %v1527_v43  ;;  %1273 = vxpose.xlu1.b32.cont [7/16] (narrow) %v1257_v40, 32  ;;  %v1823_v43 = vld [vmem:[%s2131_s14 + $0x18] sm:$0xff] }
 0x5bc   : > { %v1258_v38 = vmul.f32 %v1803_v20, %v1529_v37  ;;  %v1530_v39 = vpop.f32.mrb[18].mxu0 }
 0x5bd   : > { %v1531_v41 = vpop.f32.mrb[19].mxu0 }
 0x5be   : > { %v1532_v42 = vadd.f32 %v1531_v41, %v1530_v39  ;;  %1274 = vxpose.xlu1.b32.cont [8/16] (narrow) %v1258_v38, 32 }
 0x5c0   : > { %v1259_v26 = vmul.f32 %v1805_v49, %v1532_v42  ;;  %v1533_v28 = vpop.f32.mrb[20].mxu0 }
 0x5c1   : > { %v1534_v52 = vpop.f32.mrb[21].mxu0 }
 0x5c2   : > { %v1535_v12 = vadd.f32 %v1534_v52, %v1533_v28  ;;  %1275 = vxpose.xlu1.b32.cont [9/16] (narrow) %v1259_v26, 32 }
 0x5c4   : > { %v1260_v45 = vmul.f32 %v1807_v13, %v1535_v12  ;;  %v1536_v46 = vpop.f32.mrb[22].mxu0 }
 0x5c5   : > { %v1537_v15 = vpop.f32.mrb[23].mxu0 }
 0x5c6   : > { %v1538_v58 = vadd.f32 %v1537_v15, %v1536_v46  ;;  %1276 = vxpose.xlu1.b32.cont [10/16] (narrow) %v1260_v45, 32 }
 0x5c8   : > { %v1261_v47 = vmul.f32 %v1809_v59, %v1538_v58  ;;  %v1539_v48 = vpop.f32.mrb[24].mxu0 }
 0x5c9   : > { %v1540_v50 = vpop.f32.mrb[25].mxu0 }
 0x5ca   : > { %v1541_v51 = vadd.f32 %v1540_v50, %v1539_v48  ;;  %1277 = vxpose.xlu1.b32.cont [11/16] (narrow) %v1261_v47, 32 }
 0x5cc   : > { %v1262_v61 = vmul.f32 %v1811_v18, %v1541_v51  ;;  %v1542_v62 = vpop.f32.mrb[32].mxu1 }
 0x5cd   : > { %v1543_v19 = vpop.f32.mrb[33].mxu1 }
 0x5ce   : > { %v1544_v54 = vadd.f32 %v1543_v19, %v1542_v62  ;;  %1278 = vxpose.xlu1.b32.cont [12/16] (narrow) %v1262_v61, 32 }
 0x5d0   : > { %v1263_v21 = vmul.f32 %v1813_v55, %v1544_v54  ;;  %v1545_v22 = vpop.f32.mrb[34].mxu1 }
 0x5d1   : > { %v1546_v1 = vpop.f32.mrb[35].mxu1 }
 0x5d2   : > { %v1547_v2 = vadd.f32 %v1546_v1, %v1545_v22  ;;  %1279 = vxpose.xlu1.b32.cont [13/16] (narrow) %v1263_v21, 32 }
 0x5d4   : > { %v1264_v57 = vmul.f32 %v1815_v56, %v1547_v2  ;;  %v1548_v60 = vpop.f32.mrb[36].mxu1 }
 0x5d5   : > { %v1549_v63 = vpop.f32.mrb[37].mxu1 }
 0x5d6   : > { %v1550_v24 = vadd.f32 %v1549_v63, %v1548_v60  ;;  %1280 = vxpose.xlu1.b32.cont [14/16] (narrow) %v1264_v57, 32 }
 0x5d8   : > { %v1265_v4 = vmul.f32 %v1817_v27, %v1550_v24  ;;  %v1551_v5 = vpop.f32.mrb[38].mxu1 }
 0x5d9   : > { %v1552_v3 = vpop.f32.mrb[39].mxu1 }
 0x5da   : > { %v1553_v7 = vadd.f32 %v1552_v3, %v1551_v5  ;;  %1281 = vxpose.xlu1.b32.cont [15/16] (narrow) %v1265_v4, 32 }
 0x5dc   : > { %v1266_v17 = vmul.f32 %v1819_v10, %v1553_v7 }
 0x5de   : > { %1282 = vxpose.xlu1.b32.end [16/16] (narrow) %v1266_v17, 32 }
 0x622   : > { %v1283_v29 = vpop.trf.xlu1 }
 0x623   : > { %v1301_v8 = vmul.f32 %v1300_v25, %v1283_v29 }
 0x625   : > { %v1305_v33 = vadd.f32 %v1820_v9, %v1301_v8 }
 0x626   : > { %v1284_v36 = vpop.trf.xlu1 }
 0x627   : > { %1309 = vst [vmem:[%s2182_s19] sm:$0xff] %v1305_v33  ;;  %v1302_v30 = vmul.f32 %v1300_v25, %v1284_v36 }
 0x629   : > { %v1306_v32 = vadd.f32 %v1821_v31, %v1302_v30 }
 0x62a   : > { %v1285_v34 = vpop.trf.xlu1 }
 0x62b   : > { %1310 = vst [vmem:[%s2182_s19 + $0x8] sm:$0xff] %v1306_v32  ;;  %v1303_v11 = vmul.f32 %v1300_v25, %v1285_v34 }
 0x62d   : > { %v1307_v35 = vadd.f32 %v1822_v14, %v1303_v11 }
 0x62e   : > { %v1286_v6 = vpop.trf.xlu1 }
 0x62f   : > { %1311 = vst [vmem:[%s2182_s19 + $0x10] sm:$0xff] %v1307_v35  ;;  %v1304_v40 = vmul.f32 %v1300_v25, %v1286_v6 }
 0x631   : > { %v1308_v0 = vadd.f32 %v1823_v43, %v1304_v40 }
 0x633   : > { %1312 = vst [vmem:[%s2182_s19 + $0x18] sm:$0xff] %v1308_v0 }
 0x634   : > { %1867 = shalt.err (!%p1864_p6)
}
 0x635   : > { %s1868_s14 = scalar_lea.hbm %s2401_s2, 512  ;;  %s1872_s19 = scalar_lea.hbm %s2464_s5, 2048 }
 0x636   : > { %p1869_p7 = scmp.ne.s32.totalorder %s2401_s2, %s1868_s14  ;;  %p1873_p10 = scmp.lt.u32.totalorder %s2401_s2, %s2464_s5 }
 0x637   : > { %p1874_p9 = scmp.lt.u32.totalorder %s1872_s19, %s1868_s14  ;;  %p1876_p12 = scmp.lt.u32.totalorder %s1868_s14, %s2401_s2 }
 0x638   : > { %p1870_p2 = pnand %p1869_p7, %p2477_p0 }
 0x639   : > { %p1875_p8 = por %p1874_p9, %p1873_p10 }
 0x63a   : > { %p1871_p5 = pneg %p1870_p2 }
 0x63b   : > { %p1877_p11 = por %p1876_p12, %p1875_p8 }
 0x63d   : > { %p1878_p13 = pnand %p1877_p11, %p1871_p5 }
 0x63f   : > { %1881 = shalt.err (!%p1878_p13)
}
 0x640   : > { %s1965_s28 = smov 128   ;;  %s1966_s12 = smov 256  }
 0x641   : > { %s1967_s24 = smov 8  }
 0x642   : > { %1633 = dma.vmem_to_hbm [thread:$0]  (%p2477_p0), %s2403_s29, 512, %s2401_s2, %s1314_s23, %s1965_s28, %s1966_s12, %s1967_s24  }
 0x643 PF: > { %p1644_p1 = scmp.ge.s32.totalorder %s1952_s27, 2  ;;  %s1343_s9 = sand.u32 1, %s1924_s20  }
 0x644   : > { %p2478_p4 = scmp.ne.s32.totalorder %s2474_s13, 0  ;;  %s1344_s30 = scalar_lea.sflag [#allocation7], %s1343_s9 }
 0x646   : > { %p1640_p3 = pnand %p1644_p1, %p2478_p4 }
 0x648   : > { %1919 = dma.done.wait (!%p1640_p3), %s1344_s30, 512  }
 0x649   : > { %1921 = vsyncadd (!%p1640_p3), %s1344_s30, 4294966784  ;;  %s22_s27 = sadd.s32 1, %s1952_s27   ;;  %s2479_s10 = sld [smem:[#allocation11_spill]] }
 0x64a   : > { %p19_p6 = scmp.ge.s32.totalorder %s22_s27, 6   ;;  %s2480_s8 = sld [smem:[#allocation12_spill]] }
 0x64b   : > { %s2481_s20 = smov %s1928_s21  ;;  %s2482_s21 = smov %s1932_s22 }
 0x64c   : > { %s2483_s22 = smov %s2079_s15  ;;  %s2484_s23 = smov %s1944_s25 }
 0x64d   : > { %s2485_s24 = smov %s1948_s26  ;;  %21 = sbr.rel (!%p19_p6) target bundleno = 10 (0xa), region = 92 }
 0x64f   : > { %s2486_s25 = smov %s2479_s10 }
 0x650   : > { %s2487_s26 = smov %s2480_s8 }
 0x654   :  { %1349 = vsyncpa [#allocation6], 1 }
 0x655   :  { %1351 = vsyncpa [#allocation6 + $0x1], 1 }
 0x656   :  { %1352 = vsyncpa [#allocation7], 1 }
 0x657   :  { %1354 = vsyncpa [#allocation7 + $0x1], 1 }

</bundles_post_ra>
